<compile_context>
chip_gen: v5e
topology: v5e:2x2
jax: 0.10.0
libtpu: 0.0.40
codegen_flags: <defaults>
</compile_context>

<pallas_src>
import jax
import jax.numpy as jnp
from jax import lax
from jax.experimental import pallas as pl
from jax.experimental.pallas import tpu as pltpu


COMPUTE_DTYPE = jnp.float32   # set to jnp.bfloat16 on v6e/v7x for MXU fast path
CPAD = 128                    # lane padding for every layer's Cout
K1_PAD = 32                   # conv1 contraction 9*3=27 -> 32 (sublane aligned)
COUT_FINAL = 64               # real channel count of conv4
_CH = (3, 32, 32, 64, 64)     # channel chain: input, conv1..conv4


def _conv_out(h, k, s):
    return (h - k) // s + 1


# ---------------------------------------------------------------------------
# Fused 4-layer conv+ReLU kernel (one grid step == one sample).
# ---------------------------------------------------------------------------
def _make_fused_kernel(geom):
    (H1, W1), (H2, W2), (H3, W3), (H4, W4) = geom

    def kernel(p1_ref, w1_ref, b1_ref, w2_ref, b2_ref, w3_ref, b3_ref,
               w4_ref, b4_ref, o_ref,
               act1_ref, p2_ref, act2_ref, p3_ref, act3_ref, p4_ref):

        def dense_relu(patch, w_ref, b_ref):
            # Single big-K MXU matmul for the whole layer, f32 accumulation.
            acc = jnp.dot(patch, w_ref[...], preferred_element_type=jnp.float32)
            return jnp.maximum(acc + b_ref[...].astype(jnp.float32), 0.0)

        def build_patch(src_ref, dst_ref, wi, ho, wo, cin, stride):
            # dst[i*wo + j, (kh*3+kw)*cin + c] =
            #     src[(stride*i+kh)*wi + stride*j + kw, c]
            for i in range(ho):                        # static unroll, ho <= 6
                pieces = []
                for kh in range(3):
                    r0 = (stride * i + kh) * wi
                    if stride == 1:
                        row = src_ref[pl.ds(r0, wi), :]              # (wi, 128)
                        for kw in range(3):
                            pieces.append(row[kw:kw + wo, :cin])
                    else:
                        for kw in range(3):
                            # strided row read instead of selection-matrix matmul
                            blk = src_ref[pl.ds(r0 + kw, wo, stride=stride), :]
                            pieces.append(blk[:, :cin])
                dst_ref[pl.ds(i * wo, wo), :] = jnp.concatenate(pieces, axis=-1)

        # conv1: patches pre-assembled by the wrapper -> one matmul
        act1_ref[...] = dense_relu(p1_ref[0], w1_ref, b1_ref).astype(act1_ref.dtype)
        # conv2 (stride 2)
        build_patch(act1_ref, p2_ref, W1, H2, W2, _CH[1], 2)
        act2_ref[...] = dense_relu(p2_ref[...], w2_ref, b2_ref).astype(act2_ref.dtype)
        # conv3 (stride 1)
        build_patch(act2_ref, p3_ref, W2, H3, W3, _CH[2], 1)
        act3_ref[...] = dense_relu(p3_ref[...], w3_ref, b3_ref).astype(act3_ref.dtype)
        # conv4 (stride 1)
        build_patch(act3_ref, p4_ref, W3, H4, W4, _CH[3], 1)
        o_ref[0] = dense_relu(p4_ref[...], w4_ref, b4_ref).astype(o_ref.dtype)

    return kernel


# ---------------------------------------------------------------------------
# Parameters: deterministic init + one-time reorder/pad (hoisted out of fwd).
# ---------------------------------------------------------------------------
def init_params(key):
    def conv_init(k, cout, cin, ksz):
        kw_, kb_ = jax.random.split(k)
        fan_in = cin * ksz * ksz
        bound = 1.0 / (fan_in ** 0.5)
        w = jax.random.uniform(kw_, (cout, cin, ksz, ksz), jnp.float32, -bound, bound)
        b = jax.random.uniform(kb_, (cout,), jnp.float32, -bound, bound)
        return w, b

    k1, k2, k3, k4 = jax.random.split(key, 4)
    return {"conv1": conv_init(k1, 32, 3, 3),
            "conv2": conv_init(k2, 32, 32, 3),
            "conv3": conv_init(k3, 64, 32, 3),
            "conv4": conv_init(k4, 64, 64, 3)}


def prepare_params(raw):
    """OIHW -> ((kh*3+kw)*cin + c, cout) matmul weights.  Only Cout is padded
    to 128 lanes (plus conv1's tiny K 27->32); no zero-padded contraction."""
    kpad = {"conv1": K1_PAD, "conv2": 9 * 32, "conv3": 9 * 32, "conv4": 9 * 64}
    prepped = {}
    for name, (w, b) in raw.items():
        cout, cin, kh, kw = w.shape
        k = kh * kw * cin
        wm = jnp.transpose(w, (2, 3, 1, 0)).reshape(k, cout)
        wm = jnp.pad(wm, ((0, kpad[name] - k), (0, CPAD - cout)))
        bm = jnp.pad(b, (0, CPAD - cout)).reshape(1, CPAD)
        prepped[name] = (wm.astype(COMPUTE_DTYPE), bm.astype(COMPUTE_DTYPE))
    return prepped


# ---------------------------------------------------------------------------
# Forward pass (fully jitted; single pallas_call, grid over samples).
# ---------------------------------------------------------------------------
def _im2col_host(x_nhwc, ho, wo, stride):
    """(N, H, W, C) -> (N, ho*wo, 9*C) conv1 patch matrix (layout plumbing)."""
    pieces = []
    for kh in range(3):
        for kw in range(3):
            pieces.append(x_nhwc[:, kh:kh + stride * (ho - 1) + 1:stride,
                                    kw:kw + stride * (wo - 1) + 1:stride, :])
    p = jnp.concatenate(pieces, axis=-1)
    return p.reshape(x_nhwc.shape[0], ho * wo, 9 * x_nhwc.shape[-1])


@jax.jit
def model_forward(prepped, x_nchw):
    N, C, H, W = x_nchw.shape
    H1, W1 = _conv_out(H, 3, 2), _conv_out(W, 3, 2)
    H2, W2 = _conv_out(H1, 3, 2), _conv_out(W1, 3, 2)
    H3, W3 = _conv_out(H2, 3, 1), _conv_out(W2, 3, 1)
    H4, W4 = _conv_out(H3, 3, 1), _conv_out(W3, 3, 1)
    geom = ((H1, W1), (H2, W2), (H3, W3), (H4, W4))

    w1, b1 = prepped["conv1"]
    w2, b2 = prepped["conv2"]
    w3, b3 = prepped["conv3"]
    w4, b4 = prepped["conv4"]

    x_nhwc = jnp.transpose(x_nchw, (0, 2, 3, 1)).astype(COMPUTE_DTYPE)
    p1 = _im2col_host(x_nhwc, H1, W1, 2)                      # (N, H1*W1, 27)
    p1 = jnp.pad(p1, ((0, 0), (0, 0), (0, K1_PAD - p1.shape[-1])))

    def wspec(shape):
        return pl.BlockSpec(shape, lambda n: (0, 0))          # resident block

    out = pl.pallas_call(
        _make_fused_kernel(geom),
        out_shape=jax.ShapeDtypeStruct((N, H4 * W4, CPAD), jnp.float32),
        grid=(N,),
        in_specs=[
            pl.BlockSpec((1, H1 * W1, K1_PAD), lambda n: (n, 0, 0)),
            wspec(w1.shape), wspec(b1.shape),
            wspec(w2.shape), wspec(b2.shape),
            wspec(w3.shape), wspec(b3.shape),
            wspec(w4.shape), wspec(b4.shape),
        ],
        out_specs=pl.BlockSpec((1, H4 * W4, CPAD), lambda n: (n, 0, 0)),
        scratch_shapes=[
            pltpu.VMEM((H1 * W1, CPAD), COMPUTE_DTYPE),        # act after conv1
            pltpu.VMEM((H2 * W2, 9 * _CH[1]), COMPUTE_DTYPE),  # conv2 patches
            pltpu.VMEM((H2 * W2, CPAD), COMPUTE_DTYPE),        # act after conv2
            pltpu.VMEM((H3 * W3, 9 * _CH[2]), COMPUTE_DTYPE),  # conv3 patches
            pltpu.VMEM((H3 * W3, CPAD), COMPUTE_DTYPE),        # act after conv3
            pltpu.VMEM((H4 * W4, 9 * _CH[3]), COMPUTE_DTYPE),  # conv4 patches
        ],
        compiler_params=pltpu.CompilerParams(
            dimension_semantics=("parallel",)),
    )(p1, w1, b1, w2, b2, w3, b3, w4, b4)

    y = out[..., :COUT_FINAL].reshape(N, H4, W4, COUT_FINAL)
    return jnp.transpose(y, (0, 3, 1, 2))                     # back to NCHW


# ---------------------------------------------------------------------------
# Pure-JAX reference (numerical sanity check)
# ---------------------------------------------------------------------------
def reference_forward(raw, x_nchw):
    def conv(x, w, b, stride):
        y = lax.conv_general_dilated(
            x, w, window_strides=(stride, stride), padding="VALID",
            dimension_numbers=("NCHW", "OIHW", "NCHW"))
        return jnp.maximum(y + b.reshape(1, -1, 1, 1), 0.0)

    w1, b1 = raw["conv1"]; w2, b2 = raw["conv2"]
    w3, b3 = raw["conv3"]; w4, b4 = raw["conv4"]
    y = conv(x_nchw, w1, b1, 2)
    y = conv(y, w2, b2, 2)
    y = conv(y, w3, b3, 1)
    y = conv(y, w4, b4, 1)
    return y


if __name__ == "__main__":
    key = jax.random.PRNGKey(0)
    kp, kx = jax.random.split(key)
    raw_params = init_params(kp)
    prepped_params = prepare_params(raw_params)

    # Small input consistent with the conv stack:
    # (2, 3, 30, 30) -> conv1:14 -> conv2:6 -> conv3:4 -> conv4:2
    x = jax.random.normal(kx, (2, 3, 30, 30), jnp.float32)

    y = model_forward(prepped_params, x)
    jax.block_until_ready(y)
    assert y.shape == (2, 64, 2, 2), y.shape

    y_ref = reference_forward(raw_params, x)
    tol = 1e-3 if COMPUTE_DTYPE == jnp.float32 else 5e-2
    max_err = float(jnp.max(jnp.abs(y - y_ref)))
    assert jnp.allclose(y, y_ref, atol=tol, rtol=tol), max_err

    print("KERNEL_OK")
</pallas_src>

<mosaic_0001>
module attributes {stable_mosaic.version = 11 : i64} {
  func.func @kernel(%arg0: i32, %arg1: memref<1x196x32xf32, #tpu.memory_space<vmem>>, %arg2: memref<32x128xf32, #tpu.memory_space<vmem>>, %arg3: memref<1x128xf32, #tpu.memory_space<vmem>>, %arg4: memref<288x128xf32, #tpu.memory_space<vmem>>, %arg5: memref<1x128xf32, #tpu.memory_space<vmem>>, %arg6: memref<288x128xf32, #tpu.memory_space<vmem>>, %arg7: memref<1x128xf32, #tpu.memory_space<vmem>>, %arg8: memref<576x128xf32, #tpu.memory_space<vmem>>, %arg9: memref<1x128xf32, #tpu.memory_space<vmem>>, %arg10: memref<1x4x128xf32, #tpu.memory_space<vmem>>, %arg11: memref<196x128xf32, #tpu.memory_space<vmem>>, %arg12: memref<36x288xf32, #tpu.memory_space<vmem>>, %arg13: memref<36x128xf32, #tpu.memory_space<vmem>>, %arg14: memref<16x288xf32, #tpu.memory_space<vmem>>, %arg15: memref<16x128xf32, #tpu.memory_space<vmem>>, %arg16: memref<4x576xf32, #tpu.memory_space<vmem>>) attributes {dimension_semantics = [#tpu.dimension_semantics<parallel>], iteration_bounds = array<i64: 2>, scalar_prefetch = 0 : i64, scratch_operands = 6 : i64, tpu.core_type = #tpu.core_type<tc>, window_params = [{transform_indices = @transform_0, window_bounds = array<i64: 1, 196, 32>}, {pipeline_mode = #tpu.pipeline_mode<synchronous>, transform_indices = @transform_1, window_bounds = array<i64: 32, 128>}, {pipeline_mode = #tpu.pipeline_mode<synchronous>, transform_indices = @transform_2, window_bounds = array<i64: 1, 128>}, {pipeline_mode = #tpu.pipeline_mode<synchronous>, transform_indices = @transform_3, window_bounds = array<i64: 288, 128>}, {pipeline_mode = #tpu.pipeline_mode<synchronous>, transform_indices = @transform_4, window_bounds = array<i64: 1, 128>}, {pipeline_mode = #tpu.pipeline_mode<synchronous>, transform_indices = @transform_5, window_bounds = array<i64: 288, 128>}, {pipeline_mode = #tpu.pipeline_mode<synchronous>, transform_indices = @transform_6, window_bounds = array<i64: 1, 128>}, {pipeline_mode = #tpu.pipeline_mode<synchronous>, transform_indices = @transform_7, window_bounds = array<i64: 576, 128>}, {pipeline_mode = #tpu.pipeline_mode<synchronous>, transform_indices = @transform_8, window_bounds = array<i64: 1, 128>}, {transform_indices = @transform_9, window_bounds = array<i64: 1, 4, 128>}]} {
    %c0 = arith.constant 0 : index
    %c0_0 = arith.constant 0 : index
    %c0_1 = arith.constant 0 : index
    %0 = vector.load %arg1[%c0, %c0_0, %c0_1] : memref<1x196x32xf32, #tpu.memory_space<vmem>>, vector<1x196x32xf32>
    %1 = vector.shape_cast %0 : vector<1x196x32xf32> to vector<196x32xf32>
    %c0_2 = arith.constant 0 : index
    %c0_3 = arith.constant 0 : index
    %2 = vector.load %arg2[%c0_2, %c0_3] : memref<32x128xf32, #tpu.memory_space<vmem>>, vector<32x128xf32>
    %cst = arith.constant dense<0.000000e+00> : vector<196x128xf32>
    %3 = tpu.matmul %1, %2, %cst {dimension_numbers = #tpu.dot_dimension_numbers<[1], [0], [0], [1], [0, 0, 1, 1], [], []>} : vector<196x32xf32>, vector<32x128xf32>, vector<196x128xf32> -> vector<196x128xf32>
    %c0_4 = arith.constant 0 : index
    %c0_5 = arith.constant 0 : index
    %4 = vector.load %arg3[%c0_4, %c0_5] : memref<1x128xf32, #tpu.memory_space<vmem>>, vector<1x128xf32>
    %5 = vector.broadcast %4 : vector<1x128xf32> to vector<196x128xf32>
    %6 = arith.addf %3, %5 : vector<196x128xf32>
    %cst_6 = arith.constant 0.000000e+00 : f32
    %7 = vector.broadcast %cst_6 : f32 to vector<196x128xf32>
    %8 = arith.maximumf %6, %7 : vector<196x128xf32>
    %c0_7 = arith.constant 0 : index
    %c0_8 = arith.constant 0 : index
    %9 = vector.load %arg11[%c0_7, %c0_8] : memref<196x128xf32, #tpu.memory_space<vmem>>, vector<196x128xf32>
    tpu.vector_store %arg11[%c0_7, %c0_8], %8 {strides = array<i32>} : memref<196x128xf32, #tpu.memory_space<vmem>>, vector<196x128xf32>,
    %c0_9 = arith.constant 0 : index
    %c0_10 = arith.constant 0 : index
    %10 = tpu.strided_load %arg11[%c0_9, %c0_10] {strides = array<i32: 2, 1>} : memref<196x128xf32, #tpu.memory_space<vmem>>, vector<6x128xf32>
    %11 = vector.extract_strided_slice %10 {offsets = [0, 0], sizes = [6, 32], strides = [1, 1]} : vector<6x128xf32> to vector<6x32xf32>
    %c1 = arith.constant 1 : index
    %c0_11 = arith.constant 0 : index
    %12 = tpu.strided_load %arg11[%c1, %c0_11] {strides = array<i32: 2, 1>} : memref<196x128xf32, #tpu.memory_space<vmem>>, vector<6x128xf32>
    %13 = vector.extract_strided_slice %12 {offsets = [0, 0], sizes = [6, 32], strides = [1, 1]} : vector<6x128xf32> to vector<6x32xf32>
    %c2 = arith.constant 2 : index
    %c0_12 = arith.constant 0 : index
    %14 = tpu.strided_load %arg11[%c2, %c0_12] {strides = array<i32: 2, 1>} : memref<196x128xf32, #tpu.memory_space<vmem>>, vector<6x128xf32>
    %15 = vector.extract_strided_slice %14 {offsets = [0, 0], sizes = [6, 32], strides = [1, 1]} : vector<6x128xf32> to vector<6x32xf32>
    %c14 = arith.constant 14 : index
    %c0_13 = arith.constant 0 : index
    %16 = tpu.strided_load %arg11[%c14, %c0_13] {strides = array<i32: 2, 1>} : memref<196x128xf32, #tpu.memory_space<vmem>>, vector<6x128xf32>
    %17 = vector.extract_strided_slice %16 {offsets = [0, 0], sizes = [6, 32], strides = [1, 1]} : vector<6x128xf32> to vector<6x32xf32>
    %c15 = arith.constant 15 : index
    %c0_14 = arith.constant 0 : index
    %18 = tpu.strided_load %arg11[%c15, %c0_14] {strides = array<i32: 2, 1>} : memref<196x128xf32, #tpu.memory_space<vmem>>, vector<6x128xf32>
    %19 = vector.extract_strided_slice %18 {offsets = [0, 0], sizes = [6, 32], strides = [1, 1]} : vector<6x128xf32> to vector<6x32xf32>
    %c16 = arith.constant 16 : index
    %c0_15 = arith.constant 0 : index
    %20 = tpu.strided_load %arg11[%c16, %c0_15] {strides = array<i32: 2, 1>} : memref<196x128xf32, #tpu.memory_space<vmem>>, vector<6x128xf32>
    %21 = vector.extract_strided_slice %20 {offsets = [0, 0], sizes = [6, 32], strides = [1, 1]} : vector<6x128xf32> to vector<6x32xf32>
    %c28 = arith.constant 28 : index
    %c0_16 = arith.constant 0 : index
    %22 = tpu.strided_load %arg11[%c28, %c0_16] {strides = array<i32: 2, 1>} : memref<196x128xf32, #tpu.memory_space<vmem>>, vector<6x128xf32>
    %23 = vector.extract_strided_slice %22 {offsets = [0, 0], sizes = [6, 32], strides = [1, 1]} : vector<6x128xf32> to vector<6x32xf32>
    %c29 = arith.constant 29 : index
    %c0_17 = arith.constant 0 : index
    %24 = tpu.strided_load %arg11[%c29, %c0_17] {strides = array<i32: 2, 1>} : memref<196x128xf32, #tpu.memory_space<vmem>>, vector<6x128xf32>
    %25 = vector.extract_strided_slice %24 {offsets = [0, 0], sizes = [6, 32], strides = [1, 1]} : vector<6x128xf32> to vector<6x32xf32>
    %c30 = arith.constant 30 : index
    %c0_18 = arith.constant 0 : index
    %26 = tpu.strided_load %arg11[%c30, %c0_18] {strides = array<i32: 2, 1>} : memref<196x128xf32, #tpu.memory_space<vmem>>, vector<6x128xf32>
    %27 = vector.extract_strided_slice %26 {offsets = [0, 0], sizes = [6, 32], strides = [1, 1]} : vector<6x128xf32> to vector<6x32xf32>
    %28 = tpu.concatenate %11, %13, %15, %17, %19, %21, %23, %25, %27 in 1 : vector<6x32xf32>, vector<6x32xf32>, vector<6x32xf32>, vector<6x32xf32>, vector<6x32xf32>, vector<6x32xf32>, vector<6x32xf32>, vector<6x32xf32>, vector<6x32xf32> -> vector<6x288xf32>
    %c0_19 = arith.constant 0 : index
    %c0_20 = arith.constant 0 : index
    %29 = vector.load %arg12[%c0_19, %c0_20] : memref<36x288xf32, #tpu.memory_space<vmem>>, vector<6x288xf32>
    tpu.vector_store %arg12[%c0_19, %c0_20], %28 {strides = array<i32>} : memref<36x288xf32, #tpu.memory_space<vmem>>, vector<6x288xf32>,
    %c28_21 = arith.constant 28 : index
    %c0_22 = arith.constant 0 : index
    %30 = tpu.strided_load %arg11[%c28_21, %c0_22] {strides = array<i32: 2, 1>} : memref<196x128xf32, #tpu.memory_space<vmem>>, vector<6x128xf32>
    %31 = vector.extract_strided_slice %30 {offsets = [0, 0], sizes = [6, 32], strides = [1, 1]} : vector<6x128xf32> to vector<6x32xf32>
    %c29_23 = arith.constant 29 : index
    %c0_24 = arith.constant 0 : index
    %32 = tpu.strided_load %arg11[%c29_23, %c0_24] {strides = array<i32: 2, 1>} : memref<196x128xf32, #tpu.memory_space<vmem>>, vector<6x128xf32>
    %33 = vector.extract_strided_slice %32 {offsets = [0, 0], sizes = [6, 32], strides = [1, 1]} : vector<6x128xf32> to vector<6x32xf32>
    %c30_25 = arith.constant 30 : index
    %c0_26 = arith.constant 0 : index
    %34 = tpu.strided_load %arg11[%c30_25, %c0_26] {strides = array<i32: 2, 1>} : memref<196x128xf32, #tpu.memory_space<vmem>>, vector<6x128xf32>
    %35 = vector.extract_strided_slice %34 {offsets = [0, 0], sizes = [6, 32], strides = [1, 1]} : vector<6x128xf32> to vector<6x32xf32>
    %c42 = arith.constant 42 : index
    %c0_27 = arith.constant 0 : index
    %36 = tpu.strided_load %arg11[%c42, %c0_27] {strides = array<i32: 2, 1>} : memref<196x128xf32, #tpu.memory_space<vmem>>, vector<6x128xf32>
    %37 = vector.extract_strided_slice %36 {offsets = [0, 0], sizes = [6, 32], strides = [1, 1]} : vector<6x128xf32> to vector<6x32xf32>
    %c43 = arith.constant 43 : index
    %c0_28 = arith.constant 0 : index
    %38 = tpu.strided_load %arg11[%c43, %c0_28] {strides = array<i32: 2, 1>} : memref<196x128xf32, #tpu.memory_space<vmem>>, vector<6x128xf32>
    %39 = vector.extract_strided_slice %38 {offsets = [0, 0], sizes = [6, 32], strides = [1, 1]} : vector<6x128xf32> to vector<6x32xf32>
    %c44 = arith.constant 44 : index
    %c0_29 = arith.constant 0 : index
    %40 = tpu.strided_load %arg11[%c44, %c0_29] {strides = array<i32: 2, 1>} : memref<196x128xf32, #tpu.memory_space<vmem>>, vector<6x128xf32>
    %41 = vector.extract_strided_slice %40 {offsets = [0, 0], sizes = [6, 32], strides = [1, 1]} : vector<6x128xf32> to vector<6x32xf32>
    %c56 = arith.constant 56 : index
    %c0_30 = arith.constant 0 : index
    %42 = tpu.strided_load %arg11[%c56, %c0_30] {strides = array<i32: 2, 1>} : memref<196x128xf32, #tpu.memory_space<vmem>>, vector<6x128xf32>
    %43 = vector.extract_strided_slice %42 {offsets = [0, 0], sizes = [6, 32], strides = [1, 1]} : vector<6x128xf32> to vector<6x32xf32>
    %c57 = arith.constant 57 : index
    %c0_31 = arith.constant 0 : index
    %44 = tpu.strided_load %arg11[%c57, %c0_31] {strides = array<i32: 2, 1>} : memref<196x128xf32, #tpu.memory_space<vmem>>, vector<6x128xf32>
    %45 = vector.extract_strided_slice %44 {offsets = [0, 0], sizes = [6, 32], strides = [1, 1]} : vector<6x128xf32> to vector<6x32xf32>
    %c58 = arith.constant 58 : index
    %c0_32 = arith.constant 0 : index
    %46 = tpu.strided_load %arg11[%c58, %c0_32] {strides = array<i32: 2, 1>} : memref<196x128xf32, #tpu.memory_space<vmem>>, vector<6x128xf32>
    %47 = vector.extract_strided_slice %46 {offsets = [0, 0], sizes = [6, 32], strides = [1, 1]} : vector<6x128xf32> to vector<6x32xf32>
    %48 = tpu.concatenate %31, %33, %35, %37, %39, %41, %43, %45, %47 in 1 : vector<6x32xf32>, vector<6x32xf32>, vector<6x32xf32>, vector<6x32xf32>, vector<6x32xf32>, vector<6x32xf32>, vector<6x32xf32>, vector<6x32xf32>, vector<6x32xf32> -> vector<6x288xf32>
    %c6 = arith.constant 6 : index
    %c0_33 = arith.constant 0 : index
    %49 = vector.load %arg12[%c6, %c0_33] : memref<36x288xf32, #tpu.memory_space<vmem>>, vector<6x288xf32>
    tpu.vector_store %arg12[%c6, %c0_33], %48 {strides = array<i32>} : memref<36x288xf32, #tpu.memory_space<vmem>>, vector<6x288xf32>,
    %c56_34 = arith.constant 56 : index
    %c0_35 = arith.constant 0 : index
    %50 = tpu.strided_load %arg11[%c56_34, %c0_35] {strides = array<i32: 2, 1>} : memref<196x128xf32, #tpu.memory_space<vmem>>, vector<6x128xf32>
    %51 = vector.extract_strided_slice %50 {offsets = [0, 0], sizes = [6, 32], strides = [1, 1]} : vector<6x128xf32> to vector<6x32xf32>
    %c57_36 = arith.constant 57 : index
    %c0_37 = arith.constant 0 : index
    %52 = tpu.strided_load %arg11[%c57_36, %c0_37] {strides = array<i32: 2, 1>} : memref<196x128xf32, #tpu.memory_space<vmem>>, vector<6x128xf32>
    %53 = vector.extract_strided_slice %52 {offsets = [0, 0], sizes = [6, 32], strides = [1, 1]} : vector<6x128xf32> to vector<6x32xf32>
    %c58_38 = arith.constant 58 : index
    %c0_39 = arith.constant 0 : index
    %54 = tpu.strided_load %arg11[%c58_38, %c0_39] {strides = array<i32: 2, 1>} : memref<196x128xf32, #tpu.memory_space<vmem>>, vector<6x128xf32>
    %55 = vector.extract_strided_slice %54 {offsets = [0, 0], sizes = [6, 32], strides = [1, 1]} : vector<6x128xf32> to vector<6x32xf32>
    %c70 = arith.constant 70 : index
    %c0_40 = arith.constant 0 : index
    %56 = tpu.strided_load %arg11[%c70, %c0_40] {strides = array<i32: 2, 1>} : memref<196x128xf32, #tpu.memory_space<vmem>>, vector<6x128xf32>
    %57 = vector.extract_strided_slice %56 {offsets = [0, 0], sizes = [6, 32], strides = [1, 1]} : vector<6x128xf32> to vector<6x32xf32>
    %c71 = arith.constant 71 : index
    %c0_41 = arith.constant 0 : index
    %58 = tpu.strided_load %arg11[%c71, %c0_41] {strides = array<i32: 2, 1>} : memref<196x128xf32, #tpu.memory_space<vmem>>, vector<6x128xf32>
    %59 = vector.extract_strided_slice %58 {offsets = [0, 0], sizes = [6, 32], strides = [1, 1]} : vector<6x128xf32> to vector<6x32xf32>
    %c72 = arith.constant 72 : index
    %c0_42 = arith.constant 0 : index
    %60 = tpu.strided_load %arg11[%c72, %c0_42] {strides = array<i32: 2, 1>} : memref<196x128xf32, #tpu.memory_space<vmem>>, vector<6x128xf32>
    %61 = vector.extract_strided_slice %60 {offsets = [0, 0], sizes = [6, 32], strides = [1, 1]} : vector<6x128xf32> to vector<6x32xf32>
    %c84 = arith.constant 84 : index
    %c0_43 = arith.constant 0 : index
    %62 = tpu.strided_load %arg11[%c84, %c0_43] {strides = array<i32: 2, 1>} : memref<196x128xf32, #tpu.memory_space<vmem>>, vector<6x128xf32>
    %63 = vector.extract_strided_slice %62 {offsets = [0, 0], sizes = [6, 32], strides = [1, 1]} : vector<6x128xf32> to vector<6x32xf32>
    %c85 = arith.constant 85 : index
    %c0_44 = arith.constant 0 : index
    %64 = tpu.strided_load %arg11[%c85, %c0_44] {strides = array<i32: 2, 1>} : memref<196x128xf32, #tpu.memory_space<vmem>>, vector<6x128xf32>
    %65 = vector.extract_strided_slice %64 {offsets = [0, 0], sizes = [6, 32], strides = [1, 1]} : vector<6x128xf32> to vector<6x32xf32>
    %c86 = arith.constant 86 : index
    %c0_45 = arith.constant 0 : index
    %66 = tpu.strided_load %arg11[%c86, %c0_45] {strides = array<i32: 2, 1>} : memref<196x128xf32, #tpu.memory_space<vmem>>, vector<6x128xf32>
    %67 = vector.extract_strided_slice %66 {offsets = [0, 0], sizes = [6, 32], strides = [1, 1]} : vector<6x128xf32> to vector<6x32xf32>
    %68 = tpu.concatenate %51, %53, %55, %57, %59, %61, %63, %65, %67 in 1 : vector<6x32xf32>, vector<6x32xf32>, vector<6x32xf32>, vector<6x32xf32>, vector<6x32xf32>, vector<6x32xf32>, vector<6x32xf32>, vector<6x32xf32>, vector<6x32xf32> -> vector<6x288xf32>
    %c12 = arith.constant 12 : index
    %c0_46 = arith.constant 0 : index
    %69 = vector.load %arg12[%c12, %c0_46] : memref<36x288xf32, #tpu.memory_space<vmem>>, vector<6x288xf32>
    tpu.vector_store %arg12[%c12, %c0_46], %68 {strides = array<i32>} : memref<36x288xf32, #tpu.memory_space<vmem>>, vector<6x288xf32>,
    %c84_47 = arith.constant 84 : index
    %c0_48 = arith.constant 0 : index
    %70 = tpu.strided_load %arg11[%c84_47, %c0_48] {strides = array<i32: 2, 1>} : memref<196x128xf32, #tpu.memory_space<vmem>>, vector<6x128xf32>
    %71 = vector.extract_strided_slice %70 {offsets = [0, 0], sizes = [6, 32], strides = [1, 1]} : vector<6x128xf32> to vector<6x32xf32>
    %c85_49 = arith.constant 85 : index
    %c0_50 = arith.constant 0 : index
    %72 = tpu.strided_load %arg11[%c85_49, %c0_50] {strides = array<i32: 2, 1>} : memref<196x128xf32, #tpu.memory_space<vmem>>, vector<6x128xf32>
    %73 = vector.extract_strided_slice %72 {offsets = [0, 0], sizes = [6, 32], strides = [1, 1]} : vector<6x128xf32> to vector<6x32xf32>
    %c86_51 = arith.constant 86 : index
    %c0_52 = arith.constant 0 : index
    %74 = tpu.strided_load %arg11[%c86_51, %c0_52] {strides = array<i32: 2, 1>} : memref<196x128xf32, #tpu.memory_space<vmem>>, vector<6x128xf32>
    %75 = vector.extract_strided_slice %74 {offsets = [0, 0], sizes = [6, 32], strides = [1, 1]} : vector<6x128xf32> to vector<6x32xf32>
    %c98 = arith.constant 98 : index
    %c0_53 = arith.constant 0 : index
    %76 = tpu.strided_load %arg11[%c98, %c0_53] {strides = array<i32: 2, 1>} : memref<196x128xf32, #tpu.memory_space<vmem>>, vector<6x128xf32>
    %77 = vector.extract_strided_slice %76 {offsets = [0, 0], sizes = [6, 32], strides = [1, 1]} : vector<6x128xf32> to vector<6x32xf32>
    %c99 = arith.constant 99 : index
    %c0_54 = arith.constant 0 : index
    %78 = tpu.strided_load %arg11[%c99, %c0_54] {strides = array<i32: 2, 1>} : memref<196x128xf32, #tpu.memory_space<vmem>>, vector<6x128xf32>
    %79 = vector.extract_strided_slice %78 {offsets = [0, 0], sizes = [6, 32], strides = [1, 1]} : vector<6x128xf32> to vector<6x32xf32>
    %c100 = arith.constant 100 : index
    %c0_55 = arith.constant 0 : index
    %80 = tpu.strided_load %arg11[%c100, %c0_55] {strides = array<i32: 2, 1>} : memref<196x128xf32, #tpu.memory_space<vmem>>, vector<6x128xf32>
    %81 = vector.extract_strided_slice %80 {offsets = [0, 0], sizes = [6, 32], strides = [1, 1]} : vector<6x128xf32> to vector<6x32xf32>
    %c112 = arith.constant 112 : index
    %c0_56 = arith.constant 0 : index
    %82 = tpu.strided_load %arg11[%c112, %c0_56] {strides = array<i32: 2, 1>} : memref<196x128xf32, #tpu.memory_space<vmem>>, vector<6x128xf32>
    %83 = vector.extract_strided_slice %82 {offsets = [0, 0], sizes = [6, 32], strides = [1, 1]} : vector<6x128xf32> to vector<6x32xf32>
    %c113 = arith.constant 113 : index
    %c0_57 = arith.constant 0 : index
    %84 = tpu.strided_load %arg11[%c113, %c0_57] {strides = array<i32: 2, 1>} : memref<196x128xf32, #tpu.memory_space<vmem>>, vector<6x128xf32>
    %85 = vector.extract_strided_slice %84 {offsets = [0, 0], sizes = [6, 32], strides = [1, 1]} : vector<6x128xf32> to vector<6x32xf32>
    %c114 = arith.constant 114 : index
    %c0_58 = arith.constant 0 : index
    %86 = tpu.strided_load %arg11[%c114, %c0_58] {strides = array<i32: 2, 1>} : memref<196x128xf32, #tpu.memory_space<vmem>>, vector<6x128xf32>
    %87 = vector.extract_strided_slice %86 {offsets = [0, 0], sizes = [6, 32], strides = [1, 1]} : vector<6x128xf32> to vector<6x32xf32>
    %88 = tpu.concatenate %71, %73, %75, %77, %79, %81, %83, %85, %87 in 1 : vector<6x32xf32>, vector<6x32xf32>, vector<6x32xf32>, vector<6x32xf32>, vector<6x32xf32>, vector<6x32xf32>, vector<6x32xf32>, vector<6x32xf32>, vector<6x32xf32> -> vector<6x288xf32>
    %c18 = arith.constant 18 : index
    %c0_59 = arith.constant 0 : index
    %89 = vector.load %arg12[%c18, %c0_59] : memref<36x288xf32, #tpu.memory_space<vmem>>, vector<6x288xf32>
    tpu.vector_store %arg12[%c18, %c0_59], %88 {strides = array<i32>} : memref<36x288xf32, #tpu.memory_space<vmem>>, vector<6x288xf32>,
    %c112_60 = arith.constant 112 : index
    %c0_61 = arith.constant 0 : index
    %90 = tpu.strided_load %arg11[%c112_60, %c0_61] {strides = array<i32: 2, 1>} : memref<196x128xf32, #tpu.memory_space<vmem>>, vector<6x128xf32>
    %91 = vector.extract_strided_slice %90 {offsets = [0, 0], sizes = [6, 32], strides = [1, 1]} : vector<6x128xf32> to vector<6x32xf32>
    %c113_62 = arith.constant 113 : index
    %c0_63 = arith.constant 0 : index
    %92 = tpu.strided_load %arg11[%c113_62, %c0_63] {strides = array<i32: 2, 1>} : memref<196x128xf32, #tpu.memory_space<vmem>>, vector<6x128xf32>
    %93 = vector.extract_strided_slice %92 {offsets = [0, 0], sizes = [6, 32], strides = [1, 1]} : vector<6x128xf32> to vector<6x32xf32>
    %c114_64 = arith.constant 114 : index
    %c0_65 = arith.constant 0 : index
    %94 = tpu.strided_load %arg11[%c114_64, %c0_65] {strides = array<i32: 2, 1>} : memref<196x128xf32, #tpu.memory_space<vmem>>, vector<6x128xf32>
    %95 = vector.extract_strided_slice %94 {offsets = [0, 0], sizes = [6, 32], strides = [1, 1]} : vector<6x128xf32> to vector<6x32xf32>
    %c126 = arith.constant 126 : index
    %c0_66 = arith.constant 0 : index
    %96 = tpu.strided_load %arg11[%c126, %c0_66] {strides = array<i32: 2, 1>} : memref<196x128xf32, #tpu.memory_space<vmem>>, vector<6x128xf32>
    %97 = vector.extract_strided_slice %96 {offsets = [0, 0], sizes = [6, 32], strides = [1, 1]} : vector<6x128xf32> to vector<6x32xf32>
    %c127 = arith.constant 127 : index
    %c0_67 = arith.constant 0 : index
    %98 = tpu.strided_load %arg11[%c127, %c0_67] {strides = array<i32: 2, 1>} : memref<196x128xf32, #tpu.memory_space<vmem>>, vector<6x128xf32>
    %99 = vector.extract_strided_slice %98 {offsets = [0, 0], sizes = [6, 32], strides = [1, 1]} : vector<6x128xf32> to vector<6x32xf32>
    %c128 = arith.constant 128 : index
    %c0_68 = arith.constant 0 : index
    %100 = tpu.strided_load %arg11[%c128, %c0_68] {strides = array<i32: 2, 1>} : memref<196x128xf32, #tpu.memory_space<vmem>>, vector<6x128xf32>
    %101 = vector.extract_strided_slice %100 {offsets = [0, 0], sizes = [6, 32], strides = [1, 1]} : vector<6x128xf32> to vector<6x32xf32>
    %c140 = arith.constant 140 : index
    %c0_69 = arith.constant 0 : index
    %102 = tpu.strided_load %arg11[%c140, %c0_69] {strides = array<i32: 2, 1>} : memref<196x128xf32, #tpu.memory_space<vmem>>, vector<6x128xf32>
    %103 = vector.extract_strided_slice %102 {offsets = [0, 0], sizes = [6, 32], strides = [1, 1]} : vector<6x128xf32> to vector<6x32xf32>
    %c141 = arith.constant 141 : index
    %c0_70 = arith.constant 0 : index
    %104 = tpu.strided_load %arg11[%c141, %c0_70] {strides = array<i32: 2, 1>} : memref<196x128xf32, #tpu.memory_space<vmem>>, vector<6x128xf32>
    %105 = vector.extract_strided_slice %104 {offsets = [0, 0], sizes = [6, 32], strides = [1, 1]} : vector<6x128xf32> to vector<6x32xf32>
    %c142 = arith.constant 142 : index
    %c0_71 = arith.constant 0 : index
    %106 = tpu.strided_load %arg11[%c142, %c0_71] {strides = array<i32: 2, 1>} : memref<196x128xf32, #tpu.memory_space<vmem>>, vector<6x128xf32>
    %107 = vector.extract_strided_slice %106 {offsets = [0, 0], sizes = [6, 32], strides = [1, 1]} : vector<6x128xf32> to vector<6x32xf32>
    %108 = tpu.concatenate %91, %93, %95, %97, %99, %101, %103, %105, %107 in 1 : vector<6x32xf32>, vector<6x32xf32>, vector<6x32xf32>, vector<6x32xf32>, vector<6x32xf32>, vector<6x32xf32>, vector<6x32xf32>, vector<6x32xf32>, vector<6x32xf32> -> vector<6x288xf32>
    %c24 = arith.constant 24 : index
    %c0_72 = arith.constant 0 : index
    %109 = vector.load %arg12[%c24, %c0_72] : memref<36x288xf32, #tpu.memory_space<vmem>>, vector<6x288xf32>
    tpu.vector_store %arg12[%c24, %c0_72], %108 {strides = array<i32>} : memref<36x288xf32, #tpu.memory_space<vmem>>, vector<6x288xf32>,
    %c140_73 = arith.constant 140 : index
    %c0_74 = arith.constant 0 : index
    %110 = tpu.strided_load %arg11[%c140_73, %c0_74] {strides = array<i32: 2, 1>} : memref<196x128xf32, #tpu.memory_space<vmem>>, vector<6x128xf32>
    %111 = vector.extract_strided_slice %110 {offsets = [0, 0], sizes = [6, 32], strides = [1, 1]} : vector<6x128xf32> to vector<6x32xf32>
    %c141_75 = arith.constant 141 : index
    %c0_76 = arith.constant 0 : index
    %112 = tpu.strided_load %arg11[%c141_75, %c0_76] {strides = array<i32: 2, 1>} : memref<196x128xf32, #tpu.memory_space<vmem>>, vector<6x128xf32>
    %113 = vector.extract_strided_slice %112 {offsets = [0, 0], sizes = [6, 32], strides = [1, 1]} : vector<6x128xf32> to vector<6x32xf32>
    %c142_77 = arith.constant 142 : index
    %c0_78 = arith.constant 0 : index
    %114 = tpu.strided_load %arg11[%c142_77, %c0_78] {strides = array<i32: 2, 1>} : memref<196x128xf32, #tpu.memory_space<vmem>>, vector<6x128xf32>
    %115 = vector.extract_strided_slice %114 {offsets = [0, 0], sizes = [6, 32], strides = [1, 1]} : vector<6x128xf32> to vector<6x32xf32>
    %c154 = arith.constant 154 : index
    %c0_79 = arith.constant 0 : index
    %116 = tpu.strided_load %arg11[%c154, %c0_79] {strides = array<i32: 2, 1>} : memref<196x128xf32, #tpu.memory_space<vmem>>, vector<6x128xf32>
    %117 = vector.extract_strided_slice %116 {offsets = [0, 0], sizes = [6, 32], strides = [1, 1]} : vector<6x128xf32> to vector<6x32xf32>
    %c155 = arith.constant 155 : index
    %c0_80 = arith.constant 0 : index
    %118 = tpu.strided_load %arg11[%c155, %c0_80] {strides = array<i32: 2, 1>} : memref<196x128xf32, #tpu.memory_space<vmem>>, vector<6x128xf32>
    %119 = vector.extract_strided_slice %118 {offsets = [0, 0], sizes = [6, 32], strides = [1, 1]} : vector<6x128xf32> to vector<6x32xf32>
    %c156 = arith.constant 156 : index
    %c0_81 = arith.constant 0 : index
    %120 = tpu.strided_load %arg11[%c156, %c0_81] {strides = array<i32: 2, 1>} : memref<196x128xf32, #tpu.memory_space<vmem>>, vector<6x128xf32>
    %121 = vector.extract_strided_slice %120 {offsets = [0, 0], sizes = [6, 32], strides = [1, 1]} : vector<6x128xf32> to vector<6x32xf32>
    %c168 = arith.constant 168 : index
    %c0_82 = arith.constant 0 : index
    %122 = tpu.strided_load %arg11[%c168, %c0_82] {strides = array<i32: 2, 1>} : memref<196x128xf32, #tpu.memory_space<vmem>>, vector<6x128xf32>
    %123 = vector.extract_strided_slice %122 {offsets = [0, 0], sizes = [6, 32], strides = [1, 1]} : vector<6x128xf32> to vector<6x32xf32>
    %c169 = arith.constant 169 : index
    %c0_83 = arith.constant 0 : index
    %124 = tpu.strided_load %arg11[%c169, %c0_83] {strides = array<i32: 2, 1>} : memref<196x128xf32, #tpu.memory_space<vmem>>, vector<6x128xf32>
    %125 = vector.extract_strided_slice %124 {offsets = [0, 0], sizes = [6, 32], strides = [1, 1]} : vector<6x128xf32> to vector<6x32xf32>
    %c170 = arith.constant 170 : index
    %c0_84 = arith.constant 0 : index
    %126 = tpu.strided_load %arg11[%c170, %c0_84] {strides = array<i32: 2, 1>} : memref<196x128xf32, #tpu.memory_space<vmem>>, vector<6x128xf32>
    %127 = vector.extract_strided_slice %126 {offsets = [0, 0], sizes = [6, 32], strides = [1, 1]} : vector<6x128xf32> to vector<6x32xf32>
    %128 = tpu.concatenate %111, %113, %115, %117, %119, %121, %123, %125, %127 in 1 : vector<6x32xf32>, vector<6x32xf32>, vector<6x32xf32>, vector<6x32xf32>, vector<6x32xf32>, vector<6x32xf32>, vector<6x32xf32>, vector<6x32xf32>, vector<6x32xf32> -> vector<6x288xf32>
    %c30_85 = arith.constant 30 : index
    %c0_86 = arith.constant 0 : index
    %129 = vector.load %arg12[%c30_85, %c0_86] : memref<36x288xf32, #tpu.memory_space<vmem>>, vector<6x288xf32>
    tpu.vector_store %arg12[%c30_85, %c0_86], %128 {strides = array<i32>} : memref<36x288xf32, #tpu.memory_space<vmem>>, vector<6x288xf32>,
    %c0_87 = arith.constant 0 : index
    %c0_88 = arith.constant 0 : index
    %130 = vector.load %arg12[%c0_87, %c0_88] : memref<36x288xf32, #tpu.memory_space<vmem>>, vector<36x288xf32>
    %c0_89 = arith.constant 0 : index
    %c0_90 = arith.constant 0 : index
    %131 = vector.load %arg4[%c0_89, %c0_90] : memref<288x128xf32, #tpu.memory_space<vmem>>, vector<288x128xf32>
    %cst_91 = arith.constant dense<0.000000e+00> : vector<36x128xf32>
    %132 = tpu.matmul %130, %131, %cst_91 {dimension_numbers = #tpu.dot_dimension_numbers<[1], [0], [0], [1], [0, 0, 1, 1], [], []>} : vector<36x288xf32>, vector<288x128xf32>, vector<36x128xf32> -> vector<36x128xf32>
    %c0_92 = arith.constant 0 : index
    %c0_93 = arith.constant 0 : index
    %133 = vector.load %arg5[%c0_92, %c0_93] : memref<1x128xf32, #tpu.memory_space<vmem>>, vector<1x128xf32>
    %134 = vector.broadcast %133 : vector<1x128xf32> to vector<36x128xf32>
    %135 = arith.addf %132, %134 : vector<36x128xf32>
    %cst_94 = arith.constant 0.000000e+00 : f32
    %136 = vector.broadcast %cst_94 : f32 to vector<36x128xf32>
    %137 = arith.maximumf %135, %136 : vector<36x128xf32>
    %c0_95 = arith.constant 0 : index
    %c0_96 = arith.constant 0 : index
    %138 = vector.load %arg13[%c0_95, %c0_96] : memref<36x128xf32, #tpu.memory_space<vmem>>, vector<36x128xf32>
    tpu.vector_store %arg13[%c0_95, %c0_96], %137 {strides = array<i32>} : memref<36x128xf32, #tpu.memory_space<vmem>>, vector<36x128xf32>,
    %c0_97 = arith.constant 0 : index
    %c0_98 = arith.constant 0 : index
    %139 = vector.load %arg13[%c0_97, %c0_98] : memref<36x128xf32, #tpu.memory_space<vmem>>, vector<6x128xf32>
    %140 = vector.extract_strided_slice %139 {offsets = [0, 0], sizes = [4, 32], strides = [1, 1]} : vector<6x128xf32> to vector<4x32xf32>
    %141 = vector.extract_strided_slice %139 {offsets = [1, 0], sizes = [4, 32], strides = [1, 1]} : vector<6x128xf32> to vector<4x32xf32>
    %142 = vector.extract_strided_slice %139 {offsets = [2, 0], sizes = [4, 32], strides = [1, 1]} : vector<6x128xf32> to vector<4x32xf32>
    %c6_99 = arith.constant 6 : index
    %c0_100 = arith.constant 0 : index
    %143 = vector.load %arg13[%c6_99, %c0_100] : memref<36x128xf32, #tpu.memory_space<vmem>>, vector<6x128xf32>
    %144 = vector.extract_strided_slice %143 {offsets = [0, 0], sizes = [4, 32], strides = [1, 1]} : vector<6x128xf32> to vector<4x32xf32>
    %145 = vector.extract_strided_slice %143 {offsets = [1, 0], sizes = [4, 32], strides = [1, 1]} : vector<6x128xf32> to vector<4x32xf32>
    %146 = vector.extract_strided_slice %143 {offsets = [2, 0], sizes = [4, 32], strides = [1, 1]} : vector<6x128xf32> to vector<4x32xf32>
    %c12_101 = arith.constant 12 : index
    %c0_102 = arith.constant 0 : index
    %147 = vector.load %arg13[%c12_101, %c0_102] : memref<36x128xf32, #tpu.memory_space<vmem>>, vector<6x128xf32>
    %148 = vector.extract_strided_slice %147 {offsets = [0, 0], sizes = [4, 32], strides = [1, 1]} : vector<6x128xf32> to vector<4x32xf32>
    %149 = vector.extract_strided_slice %147 {offsets = [1, 0], sizes = [4, 32], strides = [1, 1]} : vector<6x128xf32> to vector<4x32xf32>
    %150 = vector.extract_strided_slice %147 {offsets = [2, 0], sizes = [4, 32], strides = [1, 1]} : vector<6x128xf32> to vector<4x32xf32>
    %151 = tpu.concatenate %140, %141, %142, %144, %145, %146, %148, %149, %150 in 1 : vector<4x32xf32>, vector<4x32xf32>, vector<4x32xf32>, vector<4x32xf32>, vector<4x32xf32>, vector<4x32xf32>, vector<4x32xf32>, vector<4x32xf32>, vector<4x32xf32> -> vector<4x288xf32>
    %c0_103 = arith.constant 0 : index
    %c0_104 = arith.constant 0 : index
    %152 = vector.load %arg14[%c0_103, %c0_104] : memref<16x288xf32, #tpu.memory_space<vmem>>, vector<4x288xf32>
    tpu.vector_store %arg14[%c0_103, %c0_104], %151 {strides = array<i32>} : memref<16x288xf32, #tpu.memory_space<vmem>>, vector<4x288xf32>,
    %c6_105 = arith.constant 6 : index
    %c0_106 = arith.constant 0 : index
    %153 = vector.load %arg13[%c6_105, %c0_106] : memref<36x128xf32, #tpu.memory_space<vmem>>, vector<6x128xf32>
    %154 = vector.extract_strided_slice %153 {offsets = [0, 0], sizes = [4, 32], strides = [1, 1]} : vector<6x128xf32> to vector<4x32xf32>
    %155 = vector.extract_strided_slice %153 {offsets = [1, 0], sizes = [4, 32], strides = [1, 1]} : vector<6x128xf32> to vector<4x32xf32>
    %156 = vector.extract_strided_slice %153 {offsets = [2, 0], sizes = [4, 32], strides = [1, 1]} : vector<6x128xf32> to vector<4x32xf32>
    %c12_107 = arith.constant 12 : index
    %c0_108 = arith.constant 0 : index
    %157 = vector.load %arg13[%c12_107, %c0_108] : memref<36x128xf32, #tpu.memory_space<vmem>>, vector<6x128xf32>
    %158 = vector.extract_strided_slice %157 {offsets = [0, 0], sizes = [4, 32], strides = [1, 1]} : vector<6x128xf32> to vector<4x32xf32>
    %159 = vector.extract_strided_slice %157 {offsets = [1, 0], sizes = [4, 32], strides = [1, 1]} : vector<6x128xf32> to vector<4x32xf32>
    %160 = vector.extract_strided_slice %157 {offsets = [2, 0], sizes = [4, 32], strides = [1, 1]} : vector<6x128xf32> to vector<4x32xf32>
    %c18_109 = arith.constant 18 : index
    %c0_110 = arith.constant 0 : index
    %161 = vector.load %arg13[%c18_109, %c0_110] : memref<36x128xf32, #tpu.memory_space<vmem>>, vector<6x128xf32>
    %162 = vector.extract_strided_slice %161 {offsets = [0, 0], sizes = [4, 32], strides = [1, 1]} : vector<6x128xf32> to vector<4x32xf32>
    %163 = vector.extract_strided_slice %161 {offsets = [1, 0], sizes = [4, 32], strides = [1, 1]} : vector<6x128xf32> to vector<4x32xf32>
    %164 = vector.extract_strided_slice %161 {offsets = [2, 0], sizes = [4, 32], strides = [1, 1]} : vector<6x128xf32> to vector<4x32xf32>
    %165 = tpu.concatenate %154, %155, %156, %158, %159, %160, %162, %163, %164 in 1 : vector<4x32xf32>, vector<4x32xf32>, vector<4x32xf32>, vector<4x32xf32>, vector<4x32xf32>, vector<4x32xf32>, vector<4x32xf32>, vector<4x32xf32>, vector<4x32xf32> -> vector<4x288xf32>
    %c4 = arith.constant 4 : index
    %c0_111 = arith.constant 0 : index
    %166 = vector.load %arg14[%c4, %c0_111] : memref<16x288xf32, #tpu.memory_space<vmem>>, vector<4x288xf32>
    tpu.vector_store %arg14[%c4, %c0_111], %165 {strides = array<i32>} : memref<16x288xf32, #tpu.memory_space<vmem>>, vector<4x288xf32>,
    %c12_112 = arith.constant 12 : index
    %c0_113 = arith.constant 0 : index
    %167 = vector.load %arg13[%c12_112, %c0_113] : memref<36x128xf32, #tpu.memory_space<vmem>>, vector<6x128xf32>
    %168 = vector.extract_strided_slice %167 {offsets = [0, 0], sizes = [4, 32], strides = [1, 1]} : vector<6x128xf32> to vector<4x32xf32>
    %169 = vector.extract_strided_slice %167 {offsets = [1, 0], sizes = [4, 32], strides = [1, 1]} : vector<6x128xf32> to vector<4x32xf32>
    %170 = vector.extract_strided_slice %167 {offsets = [2, 0], sizes = [4, 32], strides = [1, 1]} : vector<6x128xf32> to vector<4x32xf32>
    %c18_114 = arith.constant 18 : index
    %c0_115 = arith.constant 0 : index
    %171 = vector.load %arg13[%c18_114, %c0_115] : memref<36x128xf32, #tpu.memory_space<vmem>>, vector<6x128xf32>
    %172 = vector.extract_strided_slice %171 {offsets = [0, 0], sizes = [4, 32], strides = [1, 1]} : vector<6x128xf32> to vector<4x32xf32>
    %173 = vector.extract_strided_slice %171 {offsets = [1, 0], sizes = [4, 32], strides = [1, 1]} : vector<6x128xf32> to vector<4x32xf32>
    %174 = vector.extract_strided_slice %171 {offsets = [2, 0], sizes = [4, 32], strides = [1, 1]} : vector<6x128xf32> to vector<4x32xf32>
    %c24_116 = arith.constant 24 : index
    %c0_117 = arith.constant 0 : index
    %175 = vector.load %arg13[%c24_116, %c0_117] : memref<36x128xf32, #tpu.memory_space<vmem>>, vector<6x128xf32>
    %176 = vector.extract_strided_slice %175 {offsets = [0, 0], sizes = [4, 32], strides = [1, 1]} : vector<6x128xf32> to vector<4x32xf32>
    %177 = vector.extract_strided_slice %175 {offsets = [1, 0], sizes = [4, 32], strides = [1, 1]} : vector<6x128xf32> to vector<4x32xf32>
    %178 = vector.extract_strided_slice %175 {offsets = [2, 0], sizes = [4, 32], strides = [1, 1]} : vector<6x128xf32> to vector<4x32xf32>
    %179 = tpu.concatenate %168, %169, %170, %172, %173, %174, %176, %177, %178 in 1 : vector<4x32xf32>, vector<4x32xf32>, vector<4x32xf32>, vector<4x32xf32>, vector<4x32xf32>, vector<4x32xf32>, vector<4x32xf32>, vector<4x32xf32>, vector<4x32xf32> -> vector<4x288xf32>
    %c8 = arith.constant 8 : index
    %c0_118 = arith.constant 0 : index
    %180 = vector.load %arg14[%c8, %c0_118] : memref<16x288xf32, #tpu.memory_space<vmem>>, vector<4x288xf32>
    tpu.vector_store %arg14[%c8, %c0_118], %179 {strides = array<i32>} : memref<16x288xf32, #tpu.memory_space<vmem>>, vector<4x288xf32>,
    %c18_119 = arith.constant 18 : index
    %c0_120 = arith.constant 0 : index
    %181 = vector.load %arg13[%c18_119, %c0_120] : memref<36x128xf32, #tpu.memory_space<vmem>>, vector<6x128xf32>
    %182 = vector.extract_strided_slice %181 {offsets = [0, 0], sizes = [4, 32], strides = [1, 1]} : vector<6x128xf32> to vector<4x32xf32>
    %183 = vector.extract_strided_slice %181 {offsets = [1, 0], sizes = [4, 32], strides = [1, 1]} : vector<6x128xf32> to vector<4x32xf32>
    %184 = vector.extract_strided_slice %181 {offsets = [2, 0], sizes = [4, 32], strides = [1, 1]} : vector<6x128xf32> to vector<4x32xf32>
    %c24_121 = arith.constant 24 : index
    %c0_122 = arith.constant 0 : index
    %185 = vector.load %arg13[%c24_121, %c0_122] : memref<36x128xf32, #tpu.memory_space<vmem>>, vector<6x128xf32>
    %186 = vector.extract_strided_slice %185 {offsets = [0, 0], sizes = [4, 32], strides = [1, 1]} : vector<6x128xf32> to vector<4x32xf32>
    %187 = vector.extract_strided_slice %185 {offsets = [1, 0], sizes = [4, 32], strides = [1, 1]} : vector<6x128xf32> to vector<4x32xf32>
    %188 = vector.extract_strided_slice %185 {offsets = [2, 0], sizes = [4, 32], strides = [1, 1]} : vector<6x128xf32> to vector<4x32xf32>
    %c30_123 = arith.constant 30 : index
    %c0_124 = arith.constant 0 : index
    %189 = vector.load %arg13[%c30_123, %c0_124] : memref<36x128xf32, #tpu.memory_space<vmem>>, vector<6x128xf32>
    %190 = vector.extract_strided_slice %189 {offsets = [0, 0], sizes = [4, 32], strides = [1, 1]} : vector<6x128xf32> to vector<4x32xf32>
    %191 = vector.extract_strided_slice %189 {offsets = [1, 0], sizes = [4, 32], strides = [1, 1]} : vector<6x128xf32> to vector<4x32xf32>
    %192 = vector.extract_strided_slice %189 {offsets = [2, 0], sizes = [4, 32], strides = [1, 1]} : vector<6x128xf32> to vector<4x32xf32>
    %193 = tpu.concatenate %182, %183, %184, %186, %187, %188, %190, %191, %192 in 1 : vector<4x32xf32>, vector<4x32xf32>, vector<4x32xf32>, vector<4x32xf32>, vector<4x32xf32>, vector<4x32xf32>, vector<4x32xf32>, vector<4x32xf32>, vector<4x32xf32> -> vector<4x288xf32>
    %c12_125 = arith.constant 12 : index
    %c0_126 = arith.constant 0 : index
    %194 = vector.load %arg14[%c12_125, %c0_126] : memref<16x288xf32, #tpu.memory_space<vmem>>, vector<4x288xf32>
    tpu.vector_store %arg14[%c12_125, %c0_126], %193 {strides = array<i32>} : memref<16x288xf32, #tpu.memory_space<vmem>>, vector<4x288xf32>,
    %c0_127 = arith.constant 0 : index
    %c0_128 = arith.constant 0 : index
    %195 = vector.load %arg14[%c0_127, %c0_128] : memref<16x288xf32, #tpu.memory_space<vmem>>, vector<16x288xf32>
    %c0_129 = arith.constant 0 : index
    %c0_130 = arith.constant 0 : index
    %196 = vector.load %arg6[%c0_129, %c0_130] : memref<288x128xf32, #tpu.memory_space<vmem>>, vector<288x128xf32>
    %cst_131 = arith.constant dense<0.000000e+00> : vector<16x128xf32>
    %197 = tpu.matmul %195, %196, %cst_131 {dimension_numbers = #tpu.dot_dimension_numbers<[1], [0], [0], [1], [0, 0, 1, 1], [], []>} : vector<16x288xf32>, vector<288x128xf32>, vector<16x128xf32> -> vector<16x128xf32>
    %c0_132 = arith.constant 0 : index
    %c0_133 = arith.constant 0 : index
    %198 = vector.load %arg7[%c0_132, %c0_133] : memref<1x128xf32, #tpu.memory_space<vmem>>, vector<1x128xf32>
    %199 = vector.broadcast %198 : vector<1x128xf32> to vector<16x128xf32>
    %200 = arith.addf %197, %199 : vector<16x128xf32>
    %cst_134 = arith.constant 0.000000e+00 : f32
    %201 = vector.broadcast %cst_134 : f32 to vector<16x128xf32>
    %202 = arith.maximumf %200, %201 : vector<16x128xf32>
    %c0_135 = arith.constant 0 : index
    %c0_136 = arith.constant 0 : index
    %203 = vector.load %arg15[%c0_135, %c0_136] : memref<16x128xf32, #tpu.memory_space<vmem>>, vector<16x128xf32>
    tpu.vector_store %arg15[%c0_135, %c0_136], %202 {strides = array<i32>} : memref<16x128xf32, #tpu.memory_space<vmem>>, vector<16x128xf32>,
    %c0_137 = arith.constant 0 : index
    %c0_138 = arith.constant 0 : index
    %204 = vector.load %arg15[%c0_137, %c0_138] : memref<16x128xf32, #tpu.memory_space<vmem>>, vector<4x128xf32>
    %205 = vector.extract_strided_slice %204 {offsets = [0, 0], sizes = [2, 64], strides = [1, 1]} : vector<4x128xf32> to vector<2x64xf32>
    %206 = vector.extract_strided_slice %204 {offsets = [1, 0], sizes = [2, 64], strides = [1, 1]} : vector<4x128xf32> to vector<2x64xf32>
    %207 = vector.extract_strided_slice %204 {offsets = [2, 0], sizes = [2, 64], strides = [1, 1]} : vector<4x128xf32> to vector<2x64xf32>
    %c4_139 = arith.constant 4 : index
    %c0_140 = arith.constant 0 : index
    %208 = vector.load %arg15[%c4_139, %c0_140] : memref<16x128xf32, #tpu.memory_space<vmem>>, vector<4x128xf32>
    %209 = vector.extract_strided_slice %208 {offsets = [0, 0], sizes = [2, 64], strides = [1, 1]} : vector<4x128xf32> to vector<2x64xf32>
    %210 = vector.extract_strided_slice %208 {offsets = [1, 0], sizes = [2, 64], strides = [1, 1]} : vector<4x128xf32> to vector<2x64xf32>
    %211 = vector.extract_strided_slice %208 {offsets = [2, 0], sizes = [2, 64], strides = [1, 1]} : vector<4x128xf32> to vector<2x64xf32>
    %c8_141 = arith.constant 8 : index
    %c0_142 = arith.constant 0 : index
    %212 = vector.load %arg15[%c8_141, %c0_142] : memref<16x128xf32, #tpu.memory_space<vmem>>, vector<4x128xf32>
    %213 = vector.extract_strided_slice %212 {offsets = [0, 0], sizes = [2, 64], strides = [1, 1]} : vector<4x128xf32> to vector<2x64xf32>
    %214 = vector.extract_strided_slice %212 {offsets = [1, 0], sizes = [2, 64], strides = [1, 1]} : vector<4x128xf32> to vector<2x64xf32>
    %215 = vector.extract_strided_slice %212 {offsets = [2, 0], sizes = [2, 64], strides = [1, 1]} : vector<4x128xf32> to vector<2x64xf32>
    %216 = tpu.concatenate %205, %206, %207, %209, %210, %211, %213, %214, %215 in 1 : vector<2x64xf32>, vector<2x64xf32>, vector<2x64xf32>, vector<2x64xf32>, vector<2x64xf32>, vector<2x64xf32>, vector<2x64xf32>, vector<2x64xf32>, vector<2x64xf32> -> vector<2x576xf32>
    %c0_143 = arith.constant 0 : index
    %c0_144 = arith.constant 0 : index
    %217 = vector.load %arg16[%c0_143, %c0_144] : memref<4x576xf32, #tpu.memory_space<vmem>>, vector<2x576xf32>
    tpu.vector_store %arg16[%c0_143, %c0_144], %216 {strides = array<i32>} : memref<4x576xf32, #tpu.memory_space<vmem>>, vector<2x576xf32>,
    %c4_145 = arith.constant 4 : index
    %c0_146 = arith.constant 0 : index
    %218 = vector.load %arg15[%c4_145, %c0_146] : memref<16x128xf32, #tpu.memory_space<vmem>>, vector<4x128xf32>
    %219 = vector.extract_strided_slice %218 {offsets = [0, 0], sizes = [2, 64], strides = [1, 1]} : vector<4x128xf32> to vector<2x64xf32>
    %220 = vector.extract_strided_slice %218 {offsets = [1, 0], sizes = [2, 64], strides = [1, 1]} : vector<4x128xf32> to vector<2x64xf32>
    %221 = vector.extract_strided_slice %218 {offsets = [2, 0], sizes = [2, 64], strides = [1, 1]} : vector<4x128xf32> to vector<2x64xf32>
    %c8_147 = arith.constant 8 : index
    %c0_148 = arith.constant 0 : index
    %222 = vector.load %arg15[%c8_147, %c0_148] : memref<16x128xf32, #tpu.memory_space<vmem>>, vector<4x128xf32>
    %223 = vector.extract_strided_slice %222 {offsets = [0, 0], sizes = [2, 64], strides = [1, 1]} : vector<4x128xf32> to vector<2x64xf32>
    %224 = vector.extract_strided_slice %222 {offsets = [1, 0], sizes = [2, 64], strides = [1, 1]} : vector<4x128xf32> to vector<2x64xf32>
    %225 = vector.extract_strided_slice %222 {offsets = [2, 0], sizes = [2, 64], strides = [1, 1]} : vector<4x128xf32> to vector<2x64xf32>
    %c12_149 = arith.constant 12 : index
    %c0_150 = arith.constant 0 : index
    %226 = vector.load %arg15[%c12_149, %c0_150] : memref<16x128xf32, #tpu.memory_space<vmem>>, vector<4x128xf32>
    %227 = vector.extract_strided_slice %226 {offsets = [0, 0], sizes = [2, 64], strides = [1, 1]} : vector<4x128xf32> to vector<2x64xf32>
    %228 = vector.extract_strided_slice %226 {offsets = [1, 0], sizes = [2, 64], strides = [1, 1]} : vector<4x128xf32> to vector<2x64xf32>
    %229 = vector.extract_strided_slice %226 {offsets = [2, 0], sizes = [2, 64], strides = [1, 1]} : vector<4x128xf32> to vector<2x64xf32>
    %230 = tpu.concatenate %219, %220, %221, %223, %224, %225, %227, %228, %229 in 1 : vector<2x64xf32>, vector<2x64xf32>, vector<2x64xf32>, vector<2x64xf32>, vector<2x64xf32>, vector<2x64xf32>, vector<2x64xf32>, vector<2x64xf32>, vector<2x64xf32> -> vector<2x576xf32>
    %c2_151 = arith.constant 2 : index
    %c0_152 = arith.constant 0 : index
    %231 = vector.load %arg16[%c2_151, %c0_152] : memref<4x576xf32, #tpu.memory_space<vmem>>, vector<2x576xf32>
    tpu.vector_store %arg16[%c2_151, %c0_152], %230 {strides = array<i32>} : memref<4x576xf32, #tpu.memory_space<vmem>>, vector<2x576xf32>,
    %c0_153 = arith.constant 0 : index
    %c0_154 = arith.constant 0 : index
    %232 = vector.load %arg16[%c0_153, %c0_154] : memref<4x576xf32, #tpu.memory_space<vmem>>, vector<4x576xf32>
    %c0_155 = arith.constant 0 : index
    %c0_156 = arith.constant 0 : index
    %233 = vector.load %arg8[%c0_155, %c0_156] : memref<576x128xf32, #tpu.memory_space<vmem>>, vector<576x128xf32>
    %cst_157 = arith.constant dense<0.000000e+00> : vector<4x128xf32>
    %234 = tpu.matmul %232, %233, %cst_157 {dimension_numbers = #tpu.dot_dimension_numbers<[1], [0], [0], [1], [0, 0, 1, 1], [], []>} : vector<4x576xf32>, vector<576x128xf32>, vector<4x128xf32> -> vector<4x128xf32>
    %c0_158 = arith.constant 0 : index
    %c0_159 = arith.constant 0 : index
    %235 = vector.load %arg9[%c0_158, %c0_159] : memref<1x128xf32, #tpu.memory_space<vmem>>, vector<1x128xf32>
    %236 = vector.broadcast %235 : vector<1x128xf32> to vector<4x128xf32>
    %237 = arith.addf %234, %236 : vector<4x128xf32>
    %cst_160 = arith.constant 0.000000e+00 : f32
    %238 = vector.broadcast %cst_160 : f32 to vector<4x128xf32>
    %239 = arith.maximumf %237, %238 : vector<4x128xf32>
    %c0_161 = arith.constant 0 : index
    %c0_162 = arith.constant 0 : index
    %c0_163 = arith.constant 0 : index
    %240 = vector.load %arg10[%c0_161, %c0_162, %c0_163] : memref<1x4x128xf32, #tpu.memory_space<vmem>>, vector<1x4x128xf32>
    %241 = vector.shape_cast %240 : vector<1x4x128xf32> to vector<4x128xf32>
    %242 = vector.shape_cast %239 : vector<4x128xf32> to vector<1x4x128xf32>
    tpu.vector_store %arg10[%c0_161, %c0_162, %c0_163], %242 {strides = array<i32>} : memref<1x4x128xf32, #tpu.memory_space<vmem>>, vector<1x4x128xf32>,
    return
  }
  func.func @transform_0(%arg0: i32) -> (i32, i32, i32) {
    %c0_i32 = arith.constant 0 : i32
    %c0_i32_0 = arith.constant 0 : i32
    %c0_i32_1 = arith.constant 0 : i32
    return %arg0, %c0_i32, %c0_i32_0 : i32, i32, i32
  }
  func.func @transform_1(%arg0: i32) -> (i32, i32) {
    %c0_i32 = arith.constant 0 : i32
    %c0_i32_0 = arith.constant 0 : i32
    %c0_i32_1 = arith.constant 0 : i32
    return %c0_i32, %c0_i32_0 : i32, i32
  }
  func.func @transform_2(%arg0: i32) -> (i32, i32) {
    %c0_i32 = arith.constant 0 : i32
    %c0_i32_0 = arith.constant 0 : i32
    %c0_i32_1 = arith.constant 0 : i32
    return %c0_i32, %c0_i32_0 : i32, i32
  }
  func.func @transform_3(%arg0: i32) -> (i32, i32) {
    %c0_i32 = arith.constant 0 : i32
    %c0_i32_0 = arith.constant 0 : i32
    %c0_i32_1 = arith.constant 0 : i32
    return %c0_i32, %c0_i32_0 : i32, i32
  }
  func.func @transform_4(%arg0: i32) -> (i32, i32) {
    %c0_i32 = arith.constant 0 : i32
    %c0_i32_0 = arith.constant 0 : i32
    %c0_i32_1 = arith.constant 0 : i32
    return %c0_i32, %c0_i32_0 : i32, i32
  }
  func.func @transform_5(%arg0: i32) -> (i32, i32) {
    %c0_i32 = arith.constant 0 : i32
    %c0_i32_0 = arith.constant 0 : i32
    %c0_i32_1 = arith.constant 0 : i32
    return %c0_i32, %c0_i32_0 : i32, i32
  }
  func.func @transform_6(%arg0: i32) -> (i32, i32) {
    %c0_i32 = arith.constant 0 : i32
    %c0_i32_0 = arith.constant 0 : i32
    %c0_i32_1 = arith.constant 0 : i32
    return %c0_i32, %c0_i32_0 : i32, i32
  }
  func.func @transform_7(%arg0: i32) -> (i32, i32) {
    %c0_i32 = arith.constant 0 : i32
    %c0_i32_0 = arith.constant 0 : i32
    %c0_i32_1 = arith.constant 0 : i32
    return %c0_i32, %c0_i32_0 : i32, i32
  }
  func.func @transform_8(%arg0: i32) -> (i32, i32) {
    %c0_i32 = arith.constant 0 : i32
    %c0_i32_0 = arith.constant 0 : i32
    %c0_i32_1 = arith.constant 0 : i32
    return %c0_i32, %c0_i32_0 : i32, i32
  }
  func.func @transform_9(%arg0: i32) -> (i32, i32, i32) {
    %c0_i32 = arith.constant 0 : i32
    %c0_i32_0 = arith.constant 0 : i32
    %c0_i32_1 = arith.constant 0 : i32
    return %arg0, %c0_i32, %c0_i32_0 : i32, i32, i32
  }
}

</mosaic_0001>

<bundles_post_ra>
// kernel: model_forward.1
= control target key start
LH: loop header
LB: loop body
LE: loop exit
PB: predicated region body
PF: predicated region fallthrough
CT: control target
= control target key end

     0   :  { %14 = vsyncpa [#allocation9], 0  ;;  %s2838_s0 = inlined_call_operand.vmem [shape: f32[2,196,32], index: 0, kind: input, shape index: {}]   ;;  %s2839_s1 = inlined_call_operand.vmem [shape: f32[32,128], index: 1, kind: input, shape index: {}]   ;;  %s2840_s2 = inlined_call_operand.vmem [shape: f32[1,128], index: 2, kind: input, shape index: {}]   ;;  %s2841_s3 = inlined_call_operand.vmem [shape: f32[288,128], index: 3, kind: input, shape index: {}]   ;;  %s2842_s4 = inlined_call_operand.vmem [shape: f32[1,128], index: 4, kind: input, shape index: {}]   ;;  %s2843_s5 = inlined_call_operand.vmem [shape: f32[288,128], index: 5, kind: input, shape index: {}]   ;;  %s2844_s6 = inlined_call_operand.vmem [shape: f32[1,128], index: 6, kind: input, shape index: {}]   ;;  %s2845_s7 = inlined_call_operand.vmem [shape: f32[576,128], index: 7, kind: input, shape index: {}]   ;;  %s2846_s8 = inlined_call_operand.vmem [shape: f32[1,128], index: 8, kind: input, shape index: {}]   ;;  %s2847_s9 = inlined_call_operand.hbm [shape: f32[2,4,128], index: 9, kind: output, shape index: {}]  }
   0x1   :  { %16 = vsyncpa [#allocation9 + $0x1], 0  ;;  %s1991_s30 = smov 0   ;;  %s1993_s10 = smov 0  }
   0x2   :  { %s1995_s11 = smov 0   ;;  %s1997_s12 = smov 0  }
   0x3 LB: > { %s2012_s13 = sadd.s32 4294967295, %s1936_s12   ;;  %s1773_s14 = sadd.s32 4294967294, %s1936_s12   ;;  %s1936_s12 = sphi %s1997_s12, %s2853_s12   ;;  %s1932_s11 = sphi %s1995_s11, %s2852_s11   ;;  %s1928_s10 = sphi %s1993_s10, %s2851_s10   ;;  %s1924_s30 = sphi %s1991_s30, %s2850_s30  }
   0x4   : > { %s2016_s15 = sadd.s32 1, %s1936_s12   ;;  %s223_s16 = sadd.s32 1, %s1932_s11 }
   0x5   : > { %s220_s17 = ssub.s32 %s1936_s12, %s2016_s15  ;;  %p233_p0 = scmp.ne.s32.totalorder %s1932_s11, %s1928_s10 }
   0x6   : > { %p221_p1 = scmp.eq.s32.totalorder %s220_s17, 0  ;;  %p234_p2 = scmp.eq.s32.totalorder %s2012_s13, 1 }
   0x7   : > { %p239_p3 = scmp.ne.s32.totalorder %s1928_s10, %s1924_s30  ;;  %p240_p4 = scmp.eq.s32.totalorder %s1773_s14, 1 }
   0x8   : > { %s2027_s18 = scalar_select %p221_p1, %s1932_s11, %s223_s16  }
   0x9   : > { %p2029_p5 = por %p234_p2, %p233_p0  ;;  %p2033_p6 = por %p240_p4, %p239_p3 }
   0xa   : > { %p1776_p7 = scmp.ge.s32.totalorder %s1936_s12, 1  ;;  %p290_p8 = scmp.lt.s32.totalorder %s1936_s12, 3 }
   0xc   : > { %p291_p9 = pnand %p1776_p7, %p290_p8 }
   0xd   : > { %p326_p10 = scmp.lt.s32.totalorder (!%p291_p9), %s2012_s13, 1  ;;  %s1938_s24 = smov (!%p291_p9), 64  }
   0xe   : > { %294 = sbr.rel (%p291_p9) target bundleno = 1165 (0x48d), region = 56  ;;  %s1939_s25 = smov (!%p291_p9), 32  }
   0xf   : > { %s1940_s26 = smov (!%p291_p9), 96   ;;  %s1816_s29 = sshll.u32 (!%p291_p9), %s2012_s13, 2 }
  0x13   : > { %v359_v0 = vld [vmem:[%s2839_s1 + $0x18] sm:$0xff]  ;;  %v358_v1 = vld [vmem:[%s2839_s1 + $0x10] sm:$0xff]  ;;  %v357_v2 = vld [vmem:[%s2839_s1 + $0x8] sm:$0xff]  ;;  %s327_s27 = scalar_select %p326_p10, %s2012_s13, 1  ;;  %vm364_vm0 = vcmask 261120   ;;  %vm633_vm1 = vcmask 259072  }
  0x14   : > { %452 = vmatpush.msra.mxu0 %v359_v0  ;;  %1819 = vmatpush.msra.mxu1 %v359_v0  ;;  %v356_v3 = vld [vmem:[%s2839_s1] sm:$0xff]  ;;  %vm691_vm2 = vcmask 261126   ;;  %vm695_vm3 = vcmask 257024   ;;  %vm753_vm4 = vcmask 261124   ;;  %vm757_vm5 = vcmask 254976  }
  0x15   : > { %1820 = vmatpush.msra.mxu2 %v359_v0  ;;  %s1827_s14 = smul.u32 200, %s327_s27  ;;  %v2107_v27 = vld [vmem:[%s2840_s2] ss:$0 sm:$0xff]  ;;  %vm815_vm6 = vcmask 261122   ;;  %vm624_vm7 = vcmask 523264   ;;  %vm626_vm8 = vcmask 785408  }
  0x16   : > { %453 = vmatpush.msra.mxu0 %v358_v1  ;;  %1821 = vmatpush.msra.mxu1 %v358_v1  ;;  %vm1496_vm9 = vcmask 519170   ;;  %vm1448_vm10 = vcmask 517120   ;;  %vm1441_vm11 = vcmask 1043456   ;;  %s323_s27 = sand.u32 1, %s1928_s10  }
  0x17   : > { %1822 = vmatpush.msra.mxu2 %v358_v1  ;;  %s2056_s21 = scalar_lea.vmem %s2838_s0, %s1827_s14  ;;  %s1777_s28 = sshll.u32 %s323_s27, 2 }
  0x18   : > { %454 = vmatpush.msra.mxu0 %v357_v2  ;;  %1823 = vmatpush.msra.mxu1 %v357_v2  ;;  %v331_v4 = vld [vmem:[%s2056_s21] sm:$0xff]  ;;  %v332_v7 = vld [vmem:[%s2056_s21 + $0x8] sm:$0xff]  ;;  %v333_v10 = vld [vmem:[%s2056_s21 + $0x10] sm:$0xff]  ;;  %s1894_s14 = scalar_lea.hbm %s2847_s9, 8 }
  0x19   : > { %1824 = vmatpush.msra.mxu2 %v357_v2  ;;  %v347_v5 = vld [vmem:[%s2056_s21 + $0x80] sm:$0xff]  ;;  %v348_v8 = vld [vmem:[%s2056_s21 + $0x88] sm:$0xff]  ;;  %v349_v11 = vld [vmem:[%s2056_s21 + $0x90] sm:$0xff] }
  0x1a   : > { %455 = vmatpush.msra.mxu0 %v356_v3  ;;  %1825 = vmatpush.msra.mxu1 %v356_v3  ;;  %v351_v6 = vld [vmem:[%s2056_s21 + $0xa0] sm:$0xff]  ;;  %v352_v9 = vld [vmem:[%s2056_s21 + $0xa8] sm:$0xff]  ;;  %v353_v12 = vld [vmem:[%s2056_s21 + $0xb0] sm:$0xff] }
  0x1b   : > { %1826 = vmatpush.msra.mxu2 %v356_v3  ;;  %1779 = vmatmul.msk.f32.vlgmr.msra.gmra.mxu0 %vm364_vm0, %v331_v4  ;;  %v334_v13 = vld [vmem:[%s2056_s21 + $0x18] sm:$0xff]  ;;  %v335_v15 = vld [vmem:[%s2056_s21 + $0x20] sm:$0xff]  ;;  %v336_v16 = vld [vmem:[%s2056_s21 + $0x28] sm:$0xff] }
  0x1c   : > { %1795 = vmatmul.msk.f32.vlgmr.msra.gmra.mxu1 %vm364_vm0, %v347_v5  ;;  %1799 = vmatmul.msk.f32.vlgmr.msra.gmra.mxu2 %vm364_vm0, %v351_v6  ;;  %v350_v14 = vld [vmem:[%s2056_s21 + $0x98] sm:$0xff]  ;;  %v337_v17 = vld [vmem:[%s2056_s21 + $0x30] sm:$0xff]  ;;  %v339_v19 = vld [vmem:[%s2056_s21 + $0x40] sm:$0xff] }
  0x1d   : > { %v338_v18 = vld [vmem:[%s2056_s21 + $0x38] sm:$0xff]  ;;  %v340_v20 = vld [vmem:[%s2056_s21 + $0x48] sm:$0xff]  ;;  %v341_v21 = vld [vmem:[%s2056_s21 + $0x50] sm:$0xff] }
  0x1e   : > { %v342_v22 = vld [vmem:[%s2056_s21 + $0x58] sm:$0xff]  ;;  %v343_v23 = vld [vmem:[%s2056_s21 + $0x60] sm:$0xff]  ;;  %v344_v24 = vld [vmem:[%s2056_s21 + $0x68] sm:$0xff] }
  0x1f   : > { %v345_v25 = vld [vmem:[%s2056_s21 + $0x70] sm:$0xff]  ;;  %v346_v26 = vld [vmem:[%s2056_s21 + $0x78] sm:$0xff] }
  0x23   : > { %1780 = vmatmul.msk.f32.gmra.mxu0 %vm364_vm0, %v332_v7 }
  0x24   : > { %1796 = vmatmul.msk.f32.gmra.mxu1 %vm364_vm0, %v348_v8  ;;  %1800 = vmatmul.msk.f32.gmra.mxu2 %vm364_vm0, %v352_v9 }
  0x2b   : > { %1781 = vmatmul.msk.f32.gmra.mxu0 %vm364_vm0, %v333_v10 }
  0x2c   : > { %1797 = vmatmul.msk.f32.gmra.mxu1 %vm364_vm0, %v349_v11  ;;  %1801 = vmatmul.msk.f32.gmra.mxu2 %vm364_vm0, %v353_v12 }
  0x33   : > { %1782 = vmatmul.msk.f32.gmra.mxu0 %vm364_vm0, %v334_v13 }
  0x34   : > { %1798 = vmatmul.msk.f32.gmra.mxu1 %vm364_vm0, %v350_v14 }
  0x3b   : > { %1783 = vmatmul.msk.f32.gmra.mxu0 %vm364_vm0, %v335_v15 }
  0x43   : > { %1784 = vmatmul.msk.f32.gmra.mxu0 %vm364_vm0, %v336_v16 }
  0x4b   : > { %1785 = vmatmul.msk.f32.gmra.mxu0 %vm364_vm0, %v337_v17 }
  0x53   : > { %1786 = vmatmul.msk.f32.gmra.mxu0 %vm364_vm0, %v338_v18  ;;  %v975_v18 = vld [vmem:[%s2841_s3 + $0x118] sm:$0xff] }
  0x54   : > { %1071 = vmatpush.msra.mxu3 %v975_v18 }
  0x5b   : > { %1787 = vmatmul.msk.f32.gmra.mxu0 %vm364_vm0, %v339_v19 }
  0x63   : > { %1788 = vmatmul.msk.f32.gmra.mxu0 %vm364_vm0, %v340_v20 }
  0x6b   : > { %1789 = vmatmul.msk.f32.gmra.mxu0 %vm364_vm0, %v341_v21 }
  0x73   : > { %1790 = vmatmul.msk.f32.gmra.mxu0 %vm364_vm0, %v342_v22 }
  0x7b   : > { %1791 = vmatmul.msk.f32.gmra.mxu0 %vm364_vm0, %v343_v23 }
  0x83   : > { %1792 = vmatmul.msk.f32.gmra.mxu0 %vm364_vm0, %v344_v24  ;;  %v974_v24 = vld [vmem:[%s2841_s3 + $0x110] sm:$0xff] }
  0x84   : > { %1072 = vmatpush.msra.mxu3 %v974_v24 }
  0x8b   : > { %1793 = vmatmul.msk.f32.gmra.mxu0 %vm364_vm0, %v345_v25  ;;  %v973_v25 = vld [vmem:[%s2841_s3 + $0x108] sm:$0xff] }
  0x8c   : > { %1073 = vmatpush.msra.mxu3 %v973_v25 }
  0x93   : > { %1794 = vmatmul.msk.f32.gmra.mxu0 %vm364_vm0, %v346_v26  ;;  %v972_v26 = vld [vmem:[%s2841_s3 + $0x100] sm:$0xff] }
  0x94   : > { %1074 = vmatpush.msra.mxu3 %v972_v26  ;;  %v954_v26 = vld [vmem:[%s2841_s3 + $0x70] sm:$0xff] }
  0x98   : > { %v457_v28 = vpop.f32.mrf.mxu0 }
  0x99   : > { %v458_v29 = vadd.f32 %v2107_v27, %v457_v28  ;;  %v505_v30 = vpop.f32.mrf.mxu1 }
  0x9a   : > { %v506_v31 = vadd.f32 %v2107_v27, %v505_v30 }
  0x9b   : > { %v532_v32 = vmax.f32 %v458_v29, 0.0 }
  0x9c   : > { %v548_v33 = vmax.f32 %v506_v31, 0.0 }
  0x9d   : > { %557 = vst [vmem:[#allocation2] sm:$0xff] %v532_v32 }
  0x9e   : > { %573 = vst [vmem:[#allocation2 + $0x80] sm:$0xff] %v548_v33 }
  0x9f   : > { %v517_v34 = vpop.f32.mrf.mxu2 }
  0xa0   : > { %v518_v35 = vadd.f32 %v2107_v27, %v517_v34  ;;  %v460_v36 = vpop.f32.mrf.mxu0 }
  0xa1   : > { %v461_v37 = vadd.f32 %v2107_v27, %v460_v36  ;;  %v508_v38 = vpop.f32.mrf.mxu1 }
  0xa2   : > { %v552_v39 = vmax.f32 %v518_v35, 0.0  ;;  %v509_v40 = vadd.f32 %v2107_v27, %v508_v38 }
  0xa3   : > { %v533_v41 = vmax.f32 %v461_v37, 0.0 }
  0xa4   : > { %577 = vst [vmem:[#allocation2 + $0xa0] sm:$0xff] %v552_v39  ;;  %v549_v42 = vmax.f32 %v509_v40, 0.0 }
  0xa5   : > { %558 = vst [vmem:[#allocation2 + $0x8] sm:$0xff] %v533_v41 }
  0xa6   : > { %574 = vst [vmem:[#allocation2 + $0x88] sm:$0xff] %v549_v42 }
  0xa7   : > { %v520_v43 = vpop.f32.mrf.mxu2 }
  0xa8   : > { %v521_v44 = vadd.f32 %v2107_v27, %v520_v43  ;;  %v463_v45 = vpop.f32.mrf.mxu0 }
  0xa9   : > { %v464_v46 = vadd.f32 %v2107_v27, %v463_v45  ;;  %v511_v47 = vpop.f32.mrf.mxu1 }
  0xaa   : > { %v553_v48 = vmax.f32 %v521_v44, 0.0  ;;  %v512_v49 = vadd.f32 %v2107_v27, %v511_v47 }
  0xab   : > { %v534_v50 = vmax.f32 %v464_v46, 0.0 }
  0xac   : > { %578 = vst [vmem:[#allocation2 + $0xa8] sm:$0xff] %v553_v48  ;;  %v550_v51 = vmax.f32 %v512_v49, 0.0  ;;  %v586_v52 = vld [vmem:[#allocation2 + $0x2] ss:$2 sm:$0x3f] }
  0xad   : > { %559 = vst [vmem:[#allocation2 + $0x10] sm:$0xff] %v534_v50  ;;  %604 = vrot.lane.b32.xlu1 %v586_v52, %s1938_s24  ;;  %v584_v53 = vld [vmem:[#allocation2 + $0x1] ss:$2 sm:$0x3f] }
  0xae   : > { %575 = vst [vmem:[#allocation2 + $0x90] sm:$0xff] %v550_v51  ;;  %600 = vrot.lane.b32.xlu2 %v584_v53, %s1939_s25  ;;  %v825_v62 = vld [vmem:[#allocation2 + $0x80] ss:$2 sm:$0x3f] }
  0xaf   : > { %v523_v54 = vpop.f32.mrf.mxu2 }
  0xb0   : > { %v524_v55 = vadd.f32 %v2107_v27, %v523_v54  ;;  %v466_v56 = vpop.f32.mrf.mxu0 }
  0xb1   : > { %v467_v57 = vadd.f32 %v2107_v27, %v466_v56  ;;  %v514_v58 = vpop.f32.mrf.mxu1 }
  0xb2   : > { %v554_v59 = vmax.f32 %v524_v55, 0.0  ;;  %v515_v60 = vadd.f32 %v2107_v27, %v514_v58 }
  0xb3   : > { %v535_v61 = vmax.f32 %v467_v57, 0.0 }
  0xb4   : > { %579 = vst [vmem:[#allocation2 + $0xb0] sm:$0xff] %v554_v59  ;;  %v551_v63 = vmax.f32 %v515_v60, 0.0 }
  0xb5   : > { %560 = vst [vmem:[#allocation2 + $0x18] sm:$0xff] %v535_v61  ;;  %v827_v0 = vld [vmem:[#allocation2 + $0x8c] ss:$2 sm:$0x3f] }
  0xb6   : > { %849 = vrot.lane.b32.xlu1 %v827_v0, %s1938_s24  ;;  %845 = vrot.lane.b32.xlu2 %v825_v62, %s1939_s25  ;;  %576 = vst [vmem:[#allocation2 + $0x98] sm:$0xff] %v551_v63  ;;  %v829_v3 = vld [vmem:[#allocation2 + $0x8d] ss:$2 sm:$0x3f] }
  0xb8   : > { %v469_v1 = vpop.f32.mrf.mxu0 }
  0xb9   : > { %v470_v2 = vadd.f32 %v2107_v27, %v469_v1 }
  0xbb   : > { %v879_v4 = vld [vmem:[#allocation2 + $0xaa] ss:$2 sm:$0x3f]  ;;  %v536_v5 = vmax.f32 %v470_v2, 0.0 }
  0xbc   : > { %v877_v6 = vld [vmem:[#allocation2 + $0xa9] ss:$2 sm:$0x3f]  ;;  %v915_v7 = vrot.slane %v879_v4, 2 }
  0xbd   : > { %v831_v8 = vld [vmem:[#allocation2 + $0x8e] ss:$2 sm:$0x3f]  ;;  %561 = vst [vmem:[#allocation2 + $0x20] sm:$0xff] %v536_v5  ;;  %901 = vrot.lane.b32.xlu0 %v877_v6, %s1940_s26 }
  0xbe   : > { %v875_v9 = vld [vmem:[#allocation2 + $0xa8] ss:$2 sm:$0x3f]  ;;  %853 = vrot.lane.b32.xlu2 %v829_v3, %s1940_s26  ;;  %864 = vst.msk [vmem:[#allocation3 + $0x58] sm:$0x3f] %vm633_vm1, %v831_v8 }
  0xbf   : > { %897 = vrot.lane.b32.xlu1 %v875_v9, %s1938_s24  ;;  %921 = vst.msk [vmem:[#allocation3 + $0x58] sm:$0xc0] %vm691_vm2, %v915_v7  ;;  %v873_v12 = vld [vmem:[#allocation2 + $0x9c] ss:$2 sm:$0x3f] }
  0xc0   : > { %v472_v10 = vpop.f32.mrf.mxu0  ;;  %924 = vst.msk [vmem:[#allocation3 + $0x70] sm:$0xf] %vm695_vm3, %v915_v7  ;;  %v588_v14 = vld [vmem:[#allocation2 + $0xe] ss:$2 sm:$0x3f] }
  0xc1   : > { %v473_v11 = vadd.f32 %v2107_v27, %v472_v10  ;;  %v592_v15 = vld [vmem:[#allocation2 + $0x10] ss:$2 sm:$0x3f] }
  0xc3   : > { %v537_v13 = vmax.f32 %v473_v11, 0.0 }
  0xc4   : > { %v636_v20 = vld [vmem:[#allocation2 + $0x1d] ss:$2 sm:$0x3f]  ;;  %v594_v23 = vld [vmem:[#allocation2 + $0x1c] ss:$2 sm:$0x3f] }
  0xc5   : > { %562 = vst [vmem:[#allocation2 + $0x28] sm:$0xff] %v537_v13  ;;  %893 = vrot.lane.b32.xlu0 %v873_v12, %s1939_s25  ;;  %v596_v32 = vld [vmem:[#allocation2 + $0x1d] ss:$2 sm:$0x3f] }
  0xc6   : > { %608 = vrot.lane.b32.xlu2 %v588_v14, %s1940_s26  ;;  %v866_v14 = vld [vmem:[#allocation2 + $0x8d] ss:$2 sm:$0x3f] }
  0xc7   : > { %612 = vrot.lane.b32.xlu1 %v592_v15, %s1939_s25 }
  0xc8   : > { %v475_v16 = vpop.f32.mrf.mxu0 }
  0xc9   : > { %v476_v17 = vadd.f32 %v2107_v27, %v475_v16  ;;  %v869_v16 = vld [vmem:[#allocation2 + $0x9a] ss:$2 sm:$0x3f] }
  0xcb   : > { %v538_v19 = vmax.f32 %v476_v17, 0.0 }
  0xcc   : > { %v598_v21 = vld [vmem:[#allocation2 + $0x1e] ss:$2 sm:$0x3f] }
  0xcd   : > { %v637_v22 = vld [vmem:[#allocation2 + $0x1e] ss:$2 sm:$0x3f]  ;;  %563 = vst [vmem:[#allocation2 + $0x30] sm:$0xff] %v538_v19  ;;  %651 = vrot.lane.b32.xlu0 %v636_v20, %s1939_s25 }
  0xce   : > { %616 = vrot.lane.b32.xlu2 %v594_v23, %s1938_s24  ;;  %634 = vst.msk [vmem:[#allocation3 + $0x10] sm:$0x3f] %vm633_vm1, %v598_v21  ;;  %v582_v21 = vld [vmem:[#allocation2] ss:$2 sm:$0x3f]  ;;  %v955_v23 = vld [vmem:[%s2841_s3 + $0x78] sm:$0xff] }
  0xcf   : > { %655 = vrot.lane.b32.xlu1 %v637_v22, %s1938_s24  ;;  %995 = vmatpush.msrb.mxu1 %v955_v23  ;;  %v956_v23 = vld [vmem:[%s2841_s3 + $0x80] sm:$0xff] }
  0xd0   : > { %v478_v28 = vpop.f32.mrf.mxu0 }
  0xd1   : > { %v479_v29 = vadd.f32 %v2107_v27, %v478_v28  ;;  %996 = vmatpush.msrb.mxu1 %v954_v26 }
  0xd3   : > { %v539_v30 = vmax.f32 %v479_v29, 0.0  ;;  %v953_v29 = vld [vmem:[%s2841_s3 + $0x68] sm:$0xff] }
  0xd4   : > { %v643_v31 = vld [vmem:[#allocation2 + $0x2c] ss:$2 sm:$0x3f]  ;;  %997 = vmatpush.msrb.mxu1 %v953_v29 }
  0xd5   : > { %564 = vst [vmem:[#allocation2 + $0x38] sm:$0xff] %v539_v30  ;;  %663 = vrot.lane.b32.xlu0 %v643_v31, %s1939_s25  ;;  %v639_v36 = vld [vmem:[#allocation2 + $0x2a] ss:$2 sm:$0x3f]  ;;  %v952_v31 = vld [vmem:[%s2841_s3 + $0x60] sm:$0xff] }
  0xd6   : > { %620 = vrot.lane.b32.xlu2 %v596_v32, %s1940_s26  ;;  %v867_v30 = vld [vmem:[#allocation2 + $0x8e] ss:$2 sm:$0x3f]  ;;  %998 = vmatpush.msrb.mxu1 %v952_v31 }
  0xd7   : > { %v971_v32 = vld [vmem:[%s2841_s3 + $0xf8] sm:$0xff] }
  0xd8   : > { %v481_v33 = vpop.f32.mrf.mxu0  ;;  %1027 = vmatpush.msrb.mxu2 %v971_v32 }
  0xd9   : > { %v482_v34 = vadd.f32 %v2107_v27, %v481_v33 }
  0xdb   : > { %v540_v35 = vmax.f32 %v482_v34, 0.0  ;;  %v970_v34 = vld [vmem:[%s2841_s3 + $0xf0] sm:$0xff] }
  0xdc   : > { %1028 = vmatpush.msrb.mxu2 %v970_v34 }
  0xdd   : > { %565 = vst [vmem:[#allocation2 + $0x40] sm:$0xff] %v540_v35  ;;  %659 = vrot.lane.b32.xlu0 %v639_v36, %s1940_s26  ;;  %v951_v36 = vld [vmem:[%s2841_s3 + $0x58] sm:$0xff] }
  0xde   : > { %999 = vmatpush.msrb.mxu1 %v951_v36 }
  0xe0   : > { %v484_v37 = vpop.f32.mrf.mxu0 }
  0xe1   : > { %v485_v38 = vadd.f32 %v2107_v27, %v484_v37 }
  0xe3   : > { %v541_v39 = vmax.f32 %v485_v38, 0.0  ;;  %v950_v38 = vld [vmem:[%s2841_s3 + $0x50] sm:$0xff] }
  0xe4   : > { %v649_v40 = vld [vmem:[#allocation2 + $0x3a] ss:$2 sm:$0x3f]  ;;  %v647_v43 = vld [vmem:[#allocation2 + $0x39] ss:$2 sm:$0x3f]  ;;  %1000 = vmatpush.msrb.mxu1 %v950_v38 }
  0xe5   : > { %v645_v41 = vld [vmem:[#allocation2 + $0x38] ss:$2 sm:$0x3f]  ;;  %v685_v42 = vrot.slane %v649_v40, 2  ;;  %566 = vst [vmem:[#allocation2 + $0x48] sm:$0xff] %v541_v39  ;;  %671 = vrot.lane.b32.xlu1 %v647_v43, %s1940_s26 }
  0xe6   : > { %667 = vrot.lane.b32.xlu0 %v645_v41, %s1938_s24  ;;  %v698_v47 = vld [vmem:[#allocation2 + $0x39] ss:$2 sm:$0x3f]  ;;  %v699_v48 = vld [vmem:[#allocation2 + $0x3a] ss:$2 sm:$0x3f] }
  0xe7   : > { %692 = vst.msk [vmem:[#allocation3 + $0x10] sm:$0xc0] %vm691_vm2, %v685_v42  ;;  %v969_v41 = vld [vmem:[%s2841_s3 + $0xe8] sm:$0xff] }
  0xe8   : > { %v487_v44 = vpop.f32.mrf.mxu0  ;;  %696 = vst.msk [vmem:[#allocation3 + $0x28] sm:$0xf] %vm695_vm3, %v685_v42  ;;  %v949_v43 = vld [vmem:[%s2841_s3 + $0x48] sm:$0xff]  ;;  %1029 = vmatpush.msrb.mxu2 %v969_v41 }
  0xe9   : > { %v488_v45 = vadd.f32 %v2107_v27, %v487_v44  ;;  %v968_v44 = vld [vmem:[%s2841_s3 + $0xe0] sm:$0xff]  ;;  %1001 = vmatpush.msrb.mxu1 %v949_v43 }
  0xea   : > { %1030 = vmatpush.msrb.mxu2 %v968_v44  ;;  %v697_v41 = vld [vmem:[#allocation2 + $0x38] ss:$2 sm:$0x3f] }
  0xeb   : > { %v542_v46 = vmax.f32 %v488_v45, 0.0 }
  0xed   : > { %567 = vst [vmem:[#allocation2 + $0x50] sm:$0xff] %v542_v46  ;;  %717 = vrot.lane.b32.xlu1 %v699_v48, %s1938_s24  ;;  %v967_v46 = vld [vmem:[%s2841_s3 + $0xd8] sm:$0xff] }
  0xee   : > { %713 = vrot.lane.b32.xlu0 %v698_v47, %s1939_s25  ;;  %v927_v49 = vld [vmem:[#allocation3 + $0x10] sm:$0xff]  ;;  %1031 = vmatpush.msrb.mxu2 %v967_v46 }
  0xef   : > { %1804 = vmatmul.msk.f32.vlgmr.msra.gmra.mxu3 %vm364_vm0, %v927_v49  ;;  %v948_v47 = vld [vmem:[%s2841_s3 + $0x40] sm:$0xff]  ;;  %v966_v49 = vld [vmem:[%s2841_s3 + $0xd0] sm:$0xff] }
  0xf0   : > { %v490_v50 = vpop.f32.mrf.mxu0  ;;  %1002 = vmatpush.msrb.mxu1 %v948_v47  ;;  %1032 = vmatpush.msrb.mxu2 %v966_v49 }
  0xf1   : > { %v491_v51 = vadd.f32 %v2107_v27, %v490_v50 }
  0xf3   : > { %v543_v52 = vmax.f32 %v491_v51, 0.0  ;;  %v947_v51 = vld [vmem:[%s2841_s3 + $0x38] sm:$0xff] }
  0xf4   : > { %v705_v53 = vld [vmem:[#allocation2 + $0x48] ss:$2 sm:$0x3f]  ;;  %1003 = vmatpush.msrb.mxu1 %v947_v51 }
  0xf5   : > { %v701_v54 = vld [vmem:[#allocation2 + $0x46] ss:$2 sm:$0x3f]  ;;  %568 = vst [vmem:[#allocation2 + $0x58] sm:$0xff] %v543_v52 }
  0xf6   : > { %725 = vrot.lane.b32.xlu0 %v705_v53, %s1939_s25  ;;  %721 = vrot.lane.b32.xlu2 %v701_v54, %s1940_s26  ;;  %v936_v52 = vld [vmem:[#allocation3 + $0x58] sm:$0xff]  ;;  %v946_v54 = vld [vmem:[%s2841_s3 + $0x30] sm:$0xff] }
  0xf7   : > { %1004 = vmatpush.msrb.mxu1 %v946_v54 }
  0xf8   : > { %v493_v55 = vpop.f32.mrf.mxu0 }
  0xf9   : > { %v494_v56 = vadd.f32 %v2107_v27, %v493_v55 }
  0xfb   : > { %v544_v57 = vmax.f32 %v494_v56, 0.0 }
  0xfc   : > { %v760_v58 = vld [vmem:[#allocation2 + $0x55] ss:$2 sm:$0x3f]  ;;  %v707_v59 = vld [vmem:[#allocation2 + $0x54] ss:$2 sm:$0x3f] }
  0xfd   : > { %569 = vst [vmem:[#allocation2 + $0x60] sm:$0xff] %v544_v57  ;;  %729 = vrot.lane.b32.xlu1 %v707_v59, %s1938_s24  ;;  %v709_v60 = vld [vmem:[#allocation2 + $0x55] ss:$2 sm:$0x3f]  ;;  %v945_v57 = vld [vmem:[%s2841_s3 + $0x28] sm:$0xff] }
  0xfe   : > { %775 = vrot.lane.b32.xlu0 %v760_v58, %s1939_s25  ;;  %733 = vrot.lane.b32.xlu2 %v709_v60, %s1940_s26  ;;  %v965_v58 = vld [vmem:[%s2841_s3 + $0xc8] sm:$0xff]  ;;  %v944_v59 = vld [vmem:[%s2841_s3 + $0x20] sm:$0xff] }
  0xff   : > { %1005 = vmatpush.msrb.mxu1 %v945_v57  ;;  %1033 = vmatpush.msrb.mxu2 %v965_v58  ;;  %v964_v60 = vld [vmem:[%s2841_s3 + $0xc0] sm:$0xff] }
 0x100   : > { %v496_v61 = vpop.f32.mrf.mxu0 }
 0x101   : > { %v497_v62 = vadd.f32 %v2107_v27, %v496_v61  ;;  %v354_v61 = vld [vmem:[%s2056_s21 + $0xb8] sm:$0xff]  ;;  %1006 = vmatpush.msrb.mxu1 %v944_v59  ;;  %1034 = vmatpush.msrb.mxu2 %v964_v60 }
 0x102   : > { %1802 = vmatmul.msk.f32.gmra.mxu2 %vm364_vm0, %v354_v61  ;;  %v759_v60 = vld [vmem:[#allocation2 + $0x54] ss:$2 sm:$0x3f] }
 0x103   : > { %v545_v63 = vmax.f32 %v497_v62, 0.0  ;;  %v939_v62 = vld [vmem:[#allocation3 + $0x70] sm:$0xf] }
 0x104   : > { %v711_v0 = vld [vmem:[#allocation2 + $0x56] ss:$2 sm:$0x3f] }
 0x105   : > { %v761_v1 = vld [vmem:[#allocation2 + $0x56] ss:$2 sm:$0x3f]  ;;  %v747_v2 = vrot.slane %v711_v0, 4  ;;  %570 = vst [vmem:[#allocation2 + $0x68] sm:$0xff] %v545_v63 }
 0x106   : > { %779 = vrot.lane.b32.xlu1 %v761_v1, %s1938_s24  ;;  %v943_v63 = vld [vmem:[%s2841_s3 + $0x18] sm:$0xff]  ;;  %v871_v1 = vld [vmem:[#allocation2 + $0x9b] ss:$2 sm:$0x3f] }
 0x107   : > { %754 = vst.msk [vmem:[#allocation3 + $0x28] sm:$0xf0] %vm753_vm4, %v747_v2  ;;  %1007 = vmatpush.msrb.mxu1 %v943_v63 }
 0x108   : > { %v601_v3 = vpop.permute.xlu2 %600  ;;  %v499_v4 = vpop.f32.mrf.mxu0  ;;  %758 = vst.msk [vmem:[#allocation3 + $0x40] sm:$0x3] %vm757_vm5, %v747_v2  ;;  %v963_v2 = vld [vmem:[%s2841_s3 + $0xb8] sm:$0xff] }
 0x109   : > { %v500_v5 = vadd.f32 %v2107_v27, %v499_v4  ;;  %v942_v4 = vld [vmem:[%s2841_s3 + $0x10] sm:$0xff]  ;;  %1035 = vmatpush.msrb.mxu2 %v963_v2 }
 0x10a   : > { %1008 = vmatpush.msrb.mxu1 %v942_v4 }
 0x10b   : > { %v546_v6 = vmax.f32 %v500_v5, 0.0 }
 0x10c   : > { %v767_v7 = vld [vmem:[#allocation2 + $0x64] ss:$2 sm:$0x3f] }
 0x10d   : > { %v763_v8 = vld [vmem:[#allocation2 + $0x62] ss:$2 sm:$0x3f]  ;;  %571 = vst [vmem:[#allocation2 + $0x70] sm:$0xff] %v546_v6  ;;  %787 = vrot.lane.b32.xlu0 %v767_v7, %s1939_s25 }
 0x10e   : > { %783 = vrot.lane.b32.xlu2 %v763_v8, %s1940_s26  ;;  %v930_v9 = vld [vmem:[#allocation3 + $0x28] sm:$0xff]  ;;  %v962_v8 = vld [vmem:[%s2841_s3 + $0xb0] sm:$0xff] }
 0x10f   : > { %1805 = vmatmul.msk.f32.gmra.mxu3 %vm364_vm0, %v930_v9  ;;  %v590_v6 = vld [vmem:[#allocation2 + $0xf] ss:$2 sm:$0x3f]  ;;  %1036 = vmatpush.msrb.mxu2 %v962_v8 }
 0x110   : > { %v846_v10 = vpop.permute.xlu2 %845  ;;  %v502_v11 = vpop.f32.mrf.mxu0 }
 0x111   : > { %v503_v12 = vadd.f32 %v2107_v27, %v502_v11  ;;  %v623_v27 = vsel %vm364_vm0, %v582_v21, %v601_v3  ;;  %v959_v21 = vld [vmem:[%s2841_s3 + $0x98] sm:$0xff] }
 0x113   : > { %v547_v13 = vmax.f32 %v503_v12, 0.0 }
 0x115   : > { %572 = vst [vmem:[#allocation2 + $0x78] sm:$0xff] %v547_v13  ;;  %881 = vrot.lane.b32.xlu0 %v866_v14, %s1939_s25 }
 0x118   : > { %v854_v15 = vpop.permute.xlu2 %853 }
 0x11c   : > { %v773_v17 = vld [vmem:[#allocation2 + $0x72] ss:$2 sm:$0x3f]  ;;  %v771_v20 = vld [vmem:[#allocation2 + $0x71] ss:$2 sm:$0x3f] }
 0x11d   : > { %v769_v18 = vld [vmem:[#allocation2 + $0x70] ss:$2 sm:$0x3f]  ;;  %v809_v19 = vrot.slane %v773_v17, 6  ;;  %889 = vrot.lane.b32.xlu0 %v869_v16, %s1940_s26  ;;  %795 = vrot.lane.b32.xlu2 %v771_v20, %s1940_s26  ;;  %v961_v16 = vld [vmem:[%s2841_s3 + $0xa8] sm:$0xff] }
 0x11e   : > { %791 = vrot.lane.b32.xlu1 %v769_v18, %s1938_s24  ;;  %v818_v33 = vld [vmem:[#allocation2 + $0x71] ss:$2 sm:$0x3f]  ;;  %v823_v35 = vld [vmem:[#allocation2 + $0x7f] ss:$2 sm:$0x3f]  ;;  %1037 = vmatpush.msrb.mxu2 %v961_v16 }
 0x11f   : > { %v605_v22 = vpop.permute.xlu1 %604  ;;  %816 = vst.msk [vmem:[#allocation3 + $0x40] sm:$0xfc] %vm815_vm6, %v809_v19  ;;  %v859_v40 = vsel %vm364_vm0, %v823_v35, %v846_v10  ;;  %v819_v48 = vld [vmem:[#allocation2 + $0x72] ss:$2 sm:$0x3f] }
 0x120   : > { %v625_v24 = vsel %vm624_vm7, %v623_v27, %v605_v22  ;;  %v609_v25 = vpop.permute.xlu2 %608  ;;  %v821_v50 = vld [vmem:[#allocation2 + $0x7e] ss:$2 sm:$0x3f]  ;;  %v355_v19 = vld [vmem:[%s2056_s21 + $0xc0] sm:$0xf]  ;;  %s1699_s21 = scalar_lea.sflag [#allocation9], %s323_s27 }
 0x121   : > { %v627_v28 = vsel %vm626_vm8, %v625_v24, %v609_v25  ;;  %v940_v17 = vld [vmem:[%s2841_s3] sm:$0xff]  ;;  %1803 = vmatmul.msk.f32.gmra.mxu2 %vm364_vm0, %v355_v19  ;;  %v958_v27 = vld [vmem:[%s2841_s3 + $0x90] sm:$0xff]  ;;  %v957_v22 = vld [vmem:[%s2841_s3 + $0x88] sm:$0xff] }
 0x122   : > { %631 = vst [vmem:[#allocation3] sm:$0x3f] %v627_v28  ;;  %v960_v18 = vld [vmem:[%s2841_s3 + $0xa0] sm:$0xff] }
 0x123   : > { %1038 = vmatpush.msrb.mxu2 %v960_v18  ;;  %v635_v25 = vld [vmem:[#allocation2 + $0x1c] ss:$2 sm:$0x3f] }
 0x125   : > { %833 = vrot.lane.b32.xlu2 %v818_v33, %s1939_s25  ;;  %1039 = vmatpush.msrb.mxu2 %v959_v21  ;;  %v641_v33 = vld [vmem:[#allocation2 + $0x2b] ss:$2 sm:$0x3f] }
 0x126   : > { %885 = vrot.lane.b32.xlu1 %v867_v30, %s1938_s24  ;;  %v933_v37 = vld [vmem:[#allocation3 + $0x40] sm:$0xff] }
 0x127   : > { %1806 = vmatmul.msk.f32.gmra.mxu3 %vm364_vm0, %v933_v37  ;;  %1040 = vmatpush.msrb.mxu2 %v958_v27 }
 0x128   : > { %v850_v39 = vpop.permute.xlu1 %849  ;;  %v617_v55 = vpop.permute.xlu2 %616 }
 0x129   : > { %v860_v42 = vsel %vm624_vm7, %v859_v40, %v850_v39  ;;  %1041 = vmatpush.msrb.mxu2 %v957_v22  ;;  %v817_v22 = vld [vmem:[#allocation2 + $0x70] ss:$2 sm:$0x3f] }
 0x12a   : > { %v861_v45 = vsel %vm626_vm8, %v860_v42, %v854_v15  ;;  %v941_v15 = vld [vmem:[%s2841_s3 + $0x8] sm:$0xff] }
 0x12b   : > { %863 = vst [vmem:[#allocation3 + $0x50] sm:$0x3f] %v861_v45  ;;  %1009 = vmatpush.msrb.mxu1 %v941_v15  ;;  %1042 = vmatpush.msrb.mxu2 %v956_v23  ;;  %v865_v15 = vld [vmem:[#allocation2 + $0x8c] ss:$2 sm:$0x3f] }
 0x12d   : > { %841 = vrot.lane.b32.xlu2 %v821_v50, %s1940_s26  ;;  %1010 = vmatpush.msrb.mxu1 %v940_v17 }
 0x12e   : > { %837 = vrot.lane.b32.xlu1 %v819_v48, %s1938_s24 }
 0x12f   : > { %v902_v53 = vpop.permute.xlu0 %901  ;;  %1807 = vmatmul.msk.f32.gmra.mxu3 %vm364_vm0, %v936_v52  ;;  %v703_v52 = vld [vmem:[#allocation2 + $0x47] ss:$2 sm:$0x3f] }
 0x130   : > { %v621_v11 = vpop.permute.xlu2 %620 }
 0x131   : > { %v898_v56 = vpop.permute.xlu1 %897 }
 0x137   : > { %v894_v0 = vpop.permute.xlu0 %893  ;;  %1808 = vmatmul.msk.f32.gmra.mxu3 %vm364_vm0, %v939_v62 }
 0x138   : > { %v907_v3 = vsel %vm364_vm0, %v871_v1, %v894_v0 }
 0x139   : > { %v908_v5 = vsel %vm624_vm7, %v907_v3, %v898_v56  ;;  %v613_v7 = vpop.permute.xlu1 %612 }
 0x13a   : > { %v909_v9 = vsel %vm626_vm8, %v908_v5, %v902_v53  ;;  %v628_v10 = vsel %vm364_vm0, %v590_v6, %v613_v7  ;;  %v765_v7 = vld [vmem:[#allocation2 + $0x63] ss:$2 sm:$0x3f] }
 0x13b   : > { %v914_v12 = vrot.slane %v909_v9, 2  ;;  %v629_v13 = vsel %vm624_vm7, %v628_v10, %v617_v55 }
 0x13c   : > { %v630_v14 = vsel %vm626_vm8, %v629_v13, %v621_v11 }
 0x13d   : > { %920 = vst [vmem:[#allocation3 + $0x50] sm:$0xc0] %v914_v12 }
 0x13e   : > { %923 = vst [vmem:[#allocation3 + $0x68] sm:$0xf] %v914_v12 }
 0x13f   : > { %632 = vst [vmem:[#allocation3 + $0x8] sm:$0x3f] %v630_v14  ;;  %v652_v20 = vpop.permute.xlu0 %651 }
 0x140   : > { %v674_v26 = vsel %vm364_vm0, %v635_v25, %v652_v20 }
 0x141   : > { %v656_v28 = vpop.permute.xlu1 %655 }
 0x142   : > { %v675_v29 = vsel %vm624_vm7, %v674_v26, %v656_v28 }
 0x147   : > { %v664_v24 = vpop.permute.xlu0 %663 }
 0x148   : > { %v677_v34 = vsel %vm364_vm0, %v641_v33, %v664_v24 }
 0x14f   : > { %v660_v30 = vpop.permute.xlu0 %659 }
 0x150   : > { %v676_v31 = vsel %vm626_vm8, %v675_v29, %v660_v30  ;;  %v722_v45 = vpop.permute.xlu2 %721  ;;  %v935_v29 = vld [vmem:[#allocation3 + $0x50] sm:$0xff] }
 0x151   : > { %v683_v32 = vrot.slane %v676_v31, 2  ;;  %v938_v31 = vld [vmem:[#allocation3 + $0x68] sm:$0xf] }
 0x153   : > { %689 = vst [vmem:[#allocation3] sm:$0xc0] %v683_v32 }
 0x154   : > { %693 = vst [vmem:[#allocation3 + $0x18] sm:$0xf] %v683_v32 }
 0x157   : > { %v672_v37 = vpop.permute.xlu1 %671 }
 0x158   : > { %v668_v35 = vpop.permute.xlu0 %667  ;;  %v734_v55 = vpop.permute.xlu2 %733 }
 0x159   : > { %v678_v36 = vsel %vm624_vm7, %v677_v34, %v668_v35  ;;  %v1871_v35 = vld [vmem:[%s2842_s4] ss:$0 sm:$0xff] }
 0x15a   : > { %v679_v38 = vsel %vm626_vm8, %v678_v36, %v672_v37  ;;  %v925_v40 = vld [vmem:[#allocation3] sm:$0xff] }
 0x15b   : > { %v684_v39 = vrot.slane %v679_v38, 2  ;;  %1011 = vmatmul.f32.vlgmr.msrb.gmra.mxu1 %v925_v40 }
 0x15d   : > { %690 = vst [vmem:[#allocation3 + $0x8] sm:$0xc0] %v684_v39 }
 0x15e   : > { %694 = vst [vmem:[#allocation3 + $0x20] sm:$0xf] %v684_v39 }
 0x15f   : > { %v718_v44 = vpop.permute.xlu1 %717 }
 0x160   : > { %v714_v42 = vpop.permute.xlu0 %713 }
 0x161   : > { %v736_v43 = vsel %vm364_vm0, %v697_v41, %v714_v42 }
 0x162   : > { %v737_v46 = vsel %vm624_vm7, %v736_v43, %v718_v44 }
 0x163   : > { %v738_v47 = vsel %vm626_vm8, %v737_v46, %v722_v45 }
 0x164   : > { %v745_v48 = vrot.slane %v738_v47, 4  ;;  %v926_v49 = vld [vmem:[#allocation3 + $0x8] sm:$0xff] }
 0x165   : > { %1043 = vmatmul.f32.vlgmr.msrb.gmra.mxu2 %v926_v49 }
 0x166   : > { %751 = vst [vmem:[#allocation3 + $0x18] sm:$0xf0] %v745_v48 }
 0x167   : > { %755 = vst [vmem:[#allocation3 + $0x30] sm:$0x3] %v745_v48 }
 0x168   : > { %v726_v50 = vpop.permute.xlu0 %725  ;;  %v784_v63 = vpop.permute.xlu2 %783 }
 0x169   : > { %v739_v53 = vsel %vm364_vm0, %v703_v52, %v726_v50 }
 0x16d   : > { %v928_v51 = vld [vmem:[#allocation3 + $0x18] sm:$0xff] }
 0x16e   : > { %1014 = vmatmul.f32.gmra.mxu1 %v928_v51 }
 0x16f   : > { %v730_v54 = vpop.permute.xlu1 %729 }
 0x170   : > { %v740_v56 = vsel %vm624_vm7, %v739_v53, %v730_v54  ;;  %v776_v59 = vpop.permute.xlu0 %775 }
 0x171   : > { %v741_v57 = vsel %vm626_vm8, %v740_v56, %v734_v55  ;;  %v798_v61 = vsel %vm364_vm0, %v759_v60, %v776_v59 }
 0x172   : > { %v746_v58 = vrot.slane %v741_v57, 4  ;;  %v1076_v40 = vpop.f32.mrf.mxu3 }
 0x174   : > { %752 = vst [vmem:[#allocation3 + $0x20] sm:$0xf0] %v746_v58 }
 0x175   : > { %756 = vst [vmem:[#allocation3 + $0x38] sm:$0x3] %v746_v58 }
 0x177   : > { %v796_v6 = vpop.permute.xlu2 %795 }
 0x178   : > { %v780_v62 = vpop.permute.xlu1 %779 }
 0x179   : > { %v799_v0 = vsel %vm624_vm7, %v798_v61, %v780_v62 }
 0x17a   : > { %v800_v1 = vsel %vm626_vm8, %v799_v0, %v784_v63 }
 0x17b   : > { %v807_v2 = vrot.slane %v800_v1, 6  ;;  %v929_v3 = vld [vmem:[#allocation3 + $0x20] sm:$0xff] }
 0x17c   : > { %1046 = vmatmul.f32.gmra.mxu2 %v929_v3 }
 0x17d   : > { %813 = vst [vmem:[#allocation3 + $0x30] sm:$0xfc] %v807_v2 }
 0x17f   : > { %v788_v5 = vpop.permute.xlu0 %787  ;;  %v834_v14 = vpop.permute.xlu2 %833 }
 0x180   : > { %v801_v9 = vsel %vm364_vm0, %v765_v7, %v788_v5  ;;  %v856_v23 = vsel %vm364_vm0, %v817_v22, %v834_v14 }
 0x184   : > { %v931_v4 = vld [vmem:[#allocation3 + $0x30] sm:$0xff] }
 0x185   : > { %1017 = vmatmul.f32.gmra.mxu1 %v931_v4  ;;  %v526_v33 = vpop.f32.mrf.mxu2 }
 0x187   : > { %v882_v8 = vpop.permute.xlu0 %881  ;;  %v842_v25 = vpop.permute.xlu2 %841 }
 0x188   : > { %v904_v16 = vsel %vm364_vm0, %v865_v15, %v882_v8 }
 0x18f   : > { %v890_v18 = vpop.permute.xlu0 %889 }
 0x190   : > { %v792_v10 = vpop.permute.xlu1 %791 }
 0x191   : > { %v802_v11 = vsel %vm624_vm7, %v801_v9, %v792_v10 }
 0x192   : > { %v803_v12 = vsel %vm626_vm8, %v802_v11, %v796_v6  ;;  %v1079_v50 = vpop.f32.mrf.mxu3 }
 0x193   : > { %v808_v13 = vrot.slane %v803_v12, 6 }
 0x195   : > { %814 = vst [vmem:[#allocation3 + $0x38] sm:$0xfc] %v808_v13 }
 0x198   : > { %v886_v17 = vpop.permute.xlu1 %885 }
 0x199   : > { %v905_v19 = vsel %vm624_vm7, %v904_v16, %v886_v17 }
 0x19a   : > { %v906_v20 = vsel %vm626_vm8, %v905_v19, %v890_v18 }
 0x19b   : > { %v913_v21 = vrot.slane %v906_v20, 2 }
 0x19c   : > { %v932_v27 = vld [vmem:[#allocation3 + $0x38] sm:$0xff] }
 0x19d   : > { %919 = vst [vmem:[#allocation3 + $0x48] sm:$0xc0] %v913_v21  ;;  %1049 = vmatmul.f32.gmra.mxu2 %v932_v27 }
 0x19e   : > { %922 = vst [vmem:[#allocation3 + $0x60] sm:$0xf] %v913_v21 }
 0x1a0   : > { %v838_v24 = vpop.permute.xlu1 %837 }
 0x1a1   : > { %v857_v26 = vsel %vm624_vm7, %v856_v23, %v838_v24 }
 0x1a2   : > { %v858_v28 = vsel %vm626_vm8, %v857_v26, %v842_v25 }
 0x1a3   : > { %862 = vst [vmem:[#allocation3 + $0x48] sm:$0x3f] %v858_v28 }
 0x1a4   : > { %v529_v34 = vpop.f32.mrf.mxu2 }
 0x1a5   : > { %1052 = vmatmul.f32.gmra.mxu2 %v935_v29  ;;  %v937_v32 = vld [vmem:[#allocation3 + $0x60] sm:$0xf] }
 0x1aa   : > { %v934_v30 = vld [vmem:[#allocation3 + $0x48] sm:$0xff]  ;;  %v1082_v60 = vpop.f32.mrf.mxu3 }
 0x1ab   : > { %1020 = vmatmul.f32.gmra.mxu1 %v934_v30 }
 0x1ad   : > { %1055 = vmatmul.f32.gmra.mxu2 %v938_v31 }
 0x1b2   : > { %v1085_v4 = vpop.f32.mrf.mxu3 }
 0x1b3   : > { %1023 = vmatmul.f32.gmra.mxu1 %v937_v32 }
 0x1ba   : > { %v1088_v20 = vpop.f32.mrf.mxu3 }
 0x1d8   : > { %v1012_v36 = vpop.f32.mrf.mxu1 }
 0x1d9   : > { %v1013_v37 = vadd.f32 %v1871_v35, %v1012_v36 }
 0x1e8   : > { %v1044_v38 = vpop.f32.mrf.mxu2 }
 0x1e9   : > { %v1045_v39 = vadd.f32 %v1044_v38, %v1013_v37 }
 0x1eb   : > { %v1077_v41 = vadd.f32 %v1076_v40, %v1045_v39  ;;  %v1015_v46 = vpop.f32.mrf.mxu1  ;;  %v1300_v40 = vld [vmem:[%s2843_s5 + $0x78] sm:$0xff] }
 0x1ec   : > { %v1016_v47 = vadd.f32 %v1871_v35, %v1015_v46  ;;  %1331 = vmatpush.msrb.mxu3 %v1300_v40 }
 0x1ed   : > { %v1091_v42 = vmax.f32 %v1077_v41, 0.0  ;;  %v1299_v41 = vld [vmem:[%s2843_s5 + $0x70] sm:$0xff] }
 0x1ee   : > { %1332 = vmatpush.msrb.mxu3 %v1299_v41 }
 0x1ef   : > { %1096 = vst [vmem:[#allocation4] sm:$0xff] %v1091_v42 }
 0x1f6   : > { %v2331_v43 = vld [vmem:[#allocation4] sm:$0x3f] }
 0x1f7   : > { %v1109_v44 = vrot.slane %v2331_v43, 2  ;;  %v1105_v45 = vrot.slane %v2331_v43, 1 }
 0x1f9   : > { %1110 = vrot.lane.b32.xlu1 %v1109_v44, %s1938_s24  ;;  %1106 = vrot.lane.b32.xlu2 %v1105_v45, %s1939_s25 }
 0x1ff   : > { %v1047_v48 = vpop.f32.mrf.mxu2 }
 0x200   : > { %v1048_v49 = vadd.f32 %v1047_v48, %v1016_v47  ;;  %v1298_v48 = vld [vmem:[%s2843_s5 + $0x68] sm:$0xff] }
 0x201   : > { %1333 = vmatpush.msrb.mxu3 %v1298_v48 }
 0x202   : > { %v1080_v51 = vadd.f32 %v1079_v50, %v1048_v49  ;;  %v1018_v58 = vpop.f32.mrf.mxu1  ;;  %v1297_v49 = vld [vmem:[%s2843_s5 + $0x60] sm:$0xff]  ;;  %v1295_v50 = vld [vmem:[%s2843_s5 + $0x50] sm:$0xff] }
 0x203   : > { %v1019_v59 = vadd.f32 %v1871_v35, %v1018_v58  ;;  %1334 = vmatpush.msrb.mxu3 %v1297_v49  ;;  %v1289_v58 = vld [vmem:[%s2843_s5 + $0x20] sm:$0xff] }
 0x204   : > { %v1092_v52 = vmax.f32 %v1080_v51, 0.0  ;;  %v1294_v51 = vld [vmem:[%s2843_s5 + $0x48] sm:$0xff] }
 0x206   : > { %1097 = vst [vmem:[#allocation4 + $0x8] sm:$0xff] %v1092_v52  ;;  %v1293_v52 = vld [vmem:[%s2843_s5 + $0x40] sm:$0xff] }
 0x20d   : > { %v2337_v53 = vld [vmem:[#allocation4 + $0x6] sm:$0x3f] }
 0x20e   : > { %v2339_v54 = vld [vmem:[#allocation4 + $0x6] sm:$0x3f]  ;;  %1114 = vrot.lane.b32.xlu2 %v2337_v53, %s1940_s26  ;;  %v1119_v57 = vrot.slane %v2337_v53, 2 }
 0x20f   : > { %v1146_v55 = vrot.slane %v2339_v54, 1  ;;  %v1150_v56 = vrot.slane %v2339_v54, 2 }
 0x211   : > { %1147 = vrot.lane.b32.xlu0 %v1146_v55, %s1939_s25  ;;  %1151 = vrot.lane.b32.xlu1 %v1150_v56, %s1938_s24  ;;  %v1292_v55 = vld [vmem:[%s2843_s5 + $0x38] sm:$0xff]  ;;  %v1291_v56 = vld [vmem:[%s2843_s5 + $0x30] sm:$0xff] }
 0x216   : > { %1120 = vrot.lane.b32.xlu2 %v1119_v57, %s1939_s25  ;;  %v1290_v57 = vld [vmem:[%s2843_s5 + $0x28] sm:$0xff] }
 0x220   : > { %v1050_v61 = vpop.f32.mrf.mxu2 }
 0x221   : > { %v1051_v62 = vadd.f32 %v1050_v61, %v1019_v59  ;;  %v1288_v59 = vld [vmem:[%s2843_s5 + $0x18] sm:$0xff]  ;;  %v1286_v61 = vld [vmem:[%s2843_s5 + $0x8] sm:$0xff] }
 0x223   : > { %v1083_v63 = vadd.f32 %v1082_v60, %v1051_v62  ;;  %v1287_v60 = vld [vmem:[%s2843_s5 + $0x10] sm:$0xff]  ;;  %v1285_v62 = vld [vmem:[%s2843_s5] sm:$0xff] }
 0x225   : > { %v1093_v0 = vmax.f32 %v1083_v63, 0.0  ;;  %v1316_v63 = vld [vmem:[%s2843_s5 + $0xf8] sm:$0xff] }
 0x226   : > { %1354 = vmatpush.msra.mxu1 %v1316_v63 }
 0x227   : > { %1098 = vst [vmem:[#allocation4 + $0x10] sm:$0xff] %v1093_v0  ;;  %v1315_v0 = vld [vmem:[%s2843_s5 + $0xf0] sm:$0xff] }
 0x228   : > { %v1021_v1 = vpop.f32.mrf.mxu1  ;;  %v1053_v2 = vpop.f32.mrf.mxu2  ;;  %1355 = vmatpush.msra.mxu1 %v1315_v0 }
 0x229   : > { %v1022_v3 = vadd.f32 %v1871_v35, %v1021_v1  ;;  %v1314_v1 = vld [vmem:[%s2843_s5 + $0xe8] sm:$0xff] }
 0x22a   : > { %1356 = vmatpush.msra.mxu1 %v1314_v1 }
 0x22b   : > { %v1054_v5 = vadd.f32 %v1053_v2, %v1022_v3  ;;  %v1313_v2 = vld [vmem:[%s2843_s5 + $0xe0] sm:$0xff]  ;;  %v1312_v3 = vld [vmem:[%s2843_s5 + $0xd8] sm:$0xff] }
 0x22c   : > { %1357 = vmatpush.msra.mxu1 %v1313_v2 }
 0x22d   : > { %v1086_v6 = vadd.f32 %v1085_v4, %v1054_v5  ;;  %v1311_v4 = vld [vmem:[%s2843_s5 + $0xd0] sm:$0xff] }
 0x22e   : > { %v2349_v7 = vld [vmem:[#allocation4 + $0xc] sm:$0x3f]  ;;  %v1144_v8 = vld [vmem:[#allocation4 + $0x12] sm:$0x3f]  ;;  %1358 = vmatpush.msra.mxu1 %v1312_v3 }
 0x22f   : > { %v2351_v9 = vld [vmem:[#allocation4 + $0x12] sm:$0x3f]  ;;  %v1094_v10 = vmax.f32 %v1086_v6, 0.0  ;;  %1155 = vrot.lane.b32.xlu0 %v2349_v7, %s1940_s26  ;;  %v1809_v11 = vrot.slane %v1144_v8, 6  ;;  %1165 = vrot.lane.b32.xlu1 %v1144_v8, %s1938_s24  ;;  %v1103_v14 = vld [vmem:[#allocation4 + $0xc] sm:$0x3f] }
 0x230   : > { %1203 = vrot.lane.b32.xlu2 %v2351_v9, %s1940_s26  ;;  %v1024_v12 = vpop.f32.mrf.mxu1  ;;  %v1056_v15 = vpop.f32.mrf.mxu2  ;;  %v2359_v16 = vld [vmem:[#allocation4 + $0x12] sm:$0x3f]  ;;  %v1131_v17 = vrot.slane %v1103_v14, 2  ;;  %v2361_v19 = vld [vmem:[#allocation4 + $0xc] sm:$0x3f]  ;;  %v1160_v28 = vrot.slane %v2349_v7, 2  ;;  %1359 = vmatpush.msra.mxu1 %v1311_v4 }
 0x231   : > { %1099 = vst [vmem:[#allocation4 + $0x18] sm:$0xff] %v1094_v10  ;;  %v1025_v13 = vadd.f32 %v1871_v35, %v1024_v12  ;;  %v1235_v27 = vrot.slane %v2359_v16, 1  ;;  %v1239_v22 = vrot.slane %v2359_v16, 2  ;;  %v1194_v23 = vrot.slane %v2361_v19, 1  ;;  %v1310_v10 = vld [vmem:[%s2843_s5 + $0xc8] sm:$0xff] }
 0x232   : > { %1189 = vst.msk [vmem:[#allocation5 + $0x10] sm:$0xf0] %vm753_vm4, %v1809_v11  ;;  %v1198_v29 = vrot.slane %v2361_v19, 2  ;;  %v1127_v30 = vrot.slane %v1103_v14, 1  ;;  %v1208_v34 = vrot.slane %v2351_v9, 2  ;;  %v1168_v35 = vrot.slane %v1144_v8, 1  ;;  %1360 = vmatpush.msra.mxu1 %v1310_v10 }
 0x233   : > { %v1057_v18 = vadd.f32 %v1056_v15, %v1025_v13  ;;  %1141 = vst.msk [vmem:[#allocation5 + $0x10] sm:$0xf] %vm695_vm3, %v1131_v17  ;;  %v1309_v11 = vld [vmem:[%s2843_s5 + $0xc0] sm:$0xff]  ;;  %v1320_v13 = vld [vmem:[%s2843_s5 + $0x118] sm:$0xff] }
 0x234   : > { %1361 = vmatpush.msra.mxu1 %v1309_v11 }
 0x235   : > { %v1089_v21 = vadd.f32 %v1088_v20, %v1057_v18  ;;  %v1307_v20 = vld [vmem:[%s2843_s5 + $0xb0] sm:$0xff] }
 0x237   : > { %v1095_v24 = vmax.f32 %v1089_v21, 0.0  ;;  %1236 = vrot.lane.b32.xlu0 %v1235_v27, %s1939_s25  ;;  %1240 = vrot.lane.b32.xlu1 %v1239_v22, %s1938_s24  ;;  %v1306_v22 = vld [vmem:[%s2843_s5 + $0xa8] sm:$0xff] }
 0x238   : > { %1195 = vrot.lane.b32.xlu2 %v1194_v23, %s1939_s25  ;;  %v1192_v25 = vld [vmem:[#allocation4 + $0x18] sm:$0x3f] }
 0x239   : > { %1100 = vst [vmem:[#allocation4 + $0x20] sm:$0xf] %v1095_v24  ;;  %v1220_v26 = vrot.slane %v1192_v25, 2  ;;  %v2377_v33 = vld [vmem:[#allocation4 + $0x18] sm:$0x3f]  ;;  %v1216_v36 = vrot.slane %v1192_v25, 1 }
 0x23a   : > { %v1249_v37 = vrot.slane %v2377_v33, 2  ;;  %v1305_v23 = vld [vmem:[%s2843_s5 + $0xa0] sm:$0xff]  ;;  %v1319_v24 = vld [vmem:[%s2843_s5 + $0x110] sm:$0xff]  ;;  %v1247_v3 = vrot.slane %v2377_v33, 1 }
 0x23b   : > { %1230 = vst.msk [vmem:[#allocation5 + $0x28] sm:$0xf] %vm695_vm3, %v1220_v26  ;;  %v1304_v26 = vld [vmem:[%s2843_s5 + $0x98] sm:$0xff] }
 0x23f   : > { %1161 = vrot.lane.b32.xlu0 %v1160_v28, %s1939_s25  ;;  %1199 = vrot.lane.b32.xlu1 %v1198_v29, %s1938_s24 }
 0x240   : > { %1128 = vrot.lane.b32.xlu2 %v1127_v30, %s1940_s26  ;;  %v1233_v31 = vld [vmem:[#allocation4 + $0x1e] sm:$0x3f]  ;;  %v1303_v30 = vld [vmem:[%s2843_s5 + $0x90] sm:$0xff] }
 0x241   : > { %v1810_v32 = vrot.slane %v1233_v31, 6  ;;  %v1257_v38 = vrot.slane %v1233_v31, 1 }
 0x243   : > { %1278 = vst.msk [vmem:[#allocation5 + $0x28] sm:$0xf0] %vm753_vm4, %v1810_v32 }
 0x247   : > { %1244 = vrot.lane.b32.xlu0 %v2377_v33, %s1940_s26  ;;  %1124 = vrot.lane.b32.xlu1 %v1103_v14, %s1938_s24  ;;  %v1308_v14 = vld [vmem:[%s2843_s5 + $0xb8] sm:$0xff] }
 0x248   : > { %1209 = vrot.lane.b32.xlu2 %v1208_v34, %s1939_s25  ;;  %1362 = vmatpush.msra.mxu1 %v1308_v14  ;;  %v1302_v34 = vld [vmem:[%s2843_s5 + $0x88] sm:$0xff] }
 0x24a   : > { %1363 = vmatpush.msra.mxu1 %v1307_v20 }
 0x24c   : > { %1364 = vmatpush.msra.mxu1 %v1306_v22 }
 0x24e   : > { %1365 = vmatpush.msra.mxu1 %v1305_v23 }
 0x24f   : > { %1169 = vrot.lane.b32.xlu0 %v1168_v35, %s1940_s26  ;;  %1254 = vrot.lane.b32.xlu1 %v1233_v31, %s1938_s24  ;;  %v1301_v35 = vld [vmem:[%s2843_s5 + $0x80] sm:$0xff] }
 0x250   : > { %1217 = vrot.lane.b32.xlu2 %v1216_v36, %s1940_s26  ;;  %1366 = vmatpush.msra.mxu1 %v1304_v26  ;;  %v1317_v36 = vld [vmem:[%s2843_s5 + $0x100] sm:$0xff] }
 0x252   : > { %1367 = vmatpush.msra.mxu1 %v1303_v30 }
 0x253   : > { %v1107_v39 = vpop.permute.xlu2 %1106 }
 0x254   : > { %v1133_v42 = vsel %vm364_vm0, %v2331_v43, %v1107_v39  ;;  %v1296_v43 = vld [vmem:[%s2843_s5 + $0x58] sm:$0xff]  ;;  %1368 = vmatpush.msra.mxu1 %v1302_v34 }
 0x255   : > { %1335 = vmatpush.msrb.mxu3 %v1296_v43 }
 0x256   : > { %1369 = vmatpush.msra.mxu1 %v1301_v35 }
 0x257   : > { %1250 = vrot.lane.b32.xlu0 %v1249_v37, %s1939_s25  ;;  %1213 = vrot.lane.b32.xlu1 %v1192_v25, %s1938_s24  ;;  %v1318_v25 = vld [vmem:[%s2843_s5 + $0x108] sm:$0xff]  ;;  %s1709_s25 = scalar_lea.hbm %s2847_s9, %s1816_s29 }
 0x258   : > { %1336 = vmatpush.msrb.mxu3 %v1295_v50  ;;  %s1713_s17 = sshll.u32 %s1709_s25, 4  ;;  %s1714_s17 = int_to_ptr.hbm [resolvable:$true] %s1713_s17 }
 0x259   : > { %s1888_s22 = sshra.s32 %s1714_s17, 4  ;;  %s1889_s22 = int_to_ptr.hbm [resolvable:$true] %s1888_s22 }
 0x25a   : > { %1337 = vmatpush.msrb.mxu3 %v1294_v51  ;;  %s1890_s13 = scalar_lea.hbm %s1889_s22, 4  ;;  %p1895_p0 = scmp.lt.s32.totalorder %s1889_s22, %s2847_s9 }
 0x25b   : > { %p1891_p11 = scmp.ne.s32.totalorder %s1889_s22, %s1890_s13  ;;  %p1896_p1 = scmp.lt.s32.totalorder %s1894_s14, %s1890_s13 }
 0x25c   : > { %1338 = vmatpush.msrb.mxu3 %v1293_v52  ;;  %v1158_v52 = vrot.slane %v2349_v7, 1 }
 0x25d   : > { %p1892_p12 = pnand %p1891_p11, %p2029_p5  ;;  %p1897_p2 = por %p1896_p1, %p1895_p0 }
 0x25e   : > { %1339 = vmatpush.msrb.mxu3 %v1292_v55 }
 0x25f   : > { %1258 = vrot.lane.b32.xlu0 %v1257_v38, %s1940_s26  ;;  %p1893_p13 = pneg %p1892_p12 }
 0x260   : > { %1340 = vmatpush.msrb.mxu3 %v1291_v56 }
 0x261   : > { %p1898_p3 = pnand %p1897_p2, %p1893_p13 }
 0x262   : > { %1341 = vmatpush.msrb.mxu3 %v1290_v57 }
 0x264   : > { %1342 = vmatpush.msrb.mxu3 %v1289_v58 }
 0x266   : > { %1343 = vmatpush.msrb.mxu3 %v1288_v59 }
 0x268   : > { %v1115_v45 = vpop.permute.xlu2 %1114  ;;  %1344 = vmatpush.msrb.mxu3 %v1287_v60 }
 0x26a   : > { %1345 = vmatpush.msrb.mxu3 %v1286_v61  ;;  %v1206_v61 = vrot.slane %v2351_v9, 1 }
 0x26b   : > { %v1111_v44 = vpop.permute.xlu1 %1110 }
 0x26c   : > { %v1134_v46 = vsel %vm624_vm7, %v1133_v42, %v1111_v44  ;;  %1346 = vmatpush.msrb.mxu3 %v1285_v62 }
 0x26d   : > { %v1135_v47 = vsel %vm626_vm8, %v1134_v46, %v1115_v45  ;;  %v1117_v45 = vrot.slane %v2337_v53, 1 }
 0x26e   : > { %1139 = vst [vmem:[#allocation5] sm:$0xf] %v1135_v47  ;;  %1389 = vmatpush.msra.mxu3 %v1320_v13 }
 0x270   : > { %v1121_v8 = vpop.permute.xlu2 %1120  ;;  %1390 = vmatpush.msra.mxu3 %v1319_v24 }
 0x271   : > { %v1136_v46 = vsel %vm364_vm0, %v1117_v45, %v1121_v8  ;;  %v1516_v45 = vld [vmem:[%s2845_s7 + $0x78] sm:$0xff] }
 0x272   : > { %1391 = vmatpush.msra.mxu3 %v1318_v25  ;;  %1596 = vmatpush.msra.mxu2 %v1516_v45  ;;  %v1554_v45 = vld [vmem:[%s2845_s7 + $0x1a8] sm:$0xff] }
 0x274   : > { %1392 = vmatpush.msra.mxu3 %v1317_v36 }
 0x283   : > { %v1148_v5 = vpop.permute.xlu0 %1147  ;;  %v1152_v6 = vpop.permute.xlu1 %1151 }
 0x284   : > { %v1173_v12 = vsel %vm364_vm0, %v2339_v54, %v1148_v5  ;;  %v1281_v5 = vld [vmem:[#allocation5 + $0x10] sm:$0xff] }
 0x285   : > { %v1174_v15 = vsel %vm624_vm7, %v1173_v12, %v1152_v6  ;;  %v1284_v12 = vld [vmem:[#allocation5 + $0x28] sm:$0xff] }
 0x28a   : > { %v1204_v54 = vpop.permute.xlu2 %1203 }
 0x292   : > { %v1196_v31 = vpop.permute.xlu2 %1195 }
 0x293   : > { %v1222_v37 = vsel %vm364_vm0, %v2361_v19, %v1196_v31 }
 0x29a   : > { %v1129_v42 = vpop.permute.xlu2 %1128 }
 0x2a1   : > { %v1156_v17 = vpop.permute.xlu0 %1155  ;;  %v1166_v18 = vpop.permute.xlu1 %1165 }
 0x2a2   : > { %v1175_v21 = vsel %vm626_vm8, %v1174_v15, %v1156_v17  ;;  %v1210_v53 = vpop.permute.xlu2 %1209  ;;  %v1872_v15 = vld [vmem:[%s2844_s6] ss:$0 sm:$0xff] }
 0x2a3   : > { %v1181_v27 = vrot.slane %v1175_v21, 4  ;;  %v1225_v62 = vsel %vm364_vm0, %v1206_v61, %v1210_v53  ;;  %v1507_v53 = vld [vmem:[%s2845_s7 + $0x30] sm:$0xff] }
 0x2a4   : > { %v1527_v61 = vld [vmem:[%s2845_s7 + $0xd0] sm:$0xff] }
 0x2a5   : > { %1187 = vst [vmem:[#allocation5] sm:$0xf0] %v1181_v27 }
 0x2a9   : > { %v1237_v28 = vpop.permute.xlu0 %1236  ;;  %v1241_v29 = vpop.permute.xlu1 %1240 }
 0x2aa   : > { %v1262_v44 = vsel %vm364_vm0, %v2359_v16, %v1237_v28  ;;  %v1218_v0 = vpop.permute.xlu2 %1217 }
 0x2ab   : > { %v1263_v47 = vsel %vm624_vm7, %v1262_v44, %v1241_v29 }
 0x2ac   : > { %v1279_v32 = vld [vmem:[#allocation5] sm:$0xff] }
 0x2ad   : > { %1347 = vmatmul.f32.vlgmr.msrb.gmra.mxu3 %v1279_v32 }
 0x2b1   : > { %v1162_v38 = vpop.permute.xlu0 %1161  ;;  %v1200_v39 = vpop.permute.xlu1 %1199 }
 0x2b2   : > { %v1223_v40 = vsel %vm624_vm7, %v1222_v37, %v1200_v39  ;;  %v1176_v16 = vsel %vm364_vm0, %v1158_v52, %v1162_v38  ;;  %v1508_v52 = vld [vmem:[%s2845_s7 + $0x38] sm:$0xff] }
 0x2b3   : > { %v1224_v41 = vsel %vm626_vm8, %v1223_v40, %v1204_v54  ;;  %v1177_v56 = vsel %vm624_vm7, %v1176_v16, %v1166_v18  ;;  %v1531_v16 = vld [vmem:[%s2845_s7 + $0xf0] sm:$0xff] }
 0x2b4   : > { %1228 = vst [vmem:[#allocation5 + $0x18] sm:$0xf] %v1224_v41 }
 0x2b9   : > { %v1245_v48 = vpop.permute.xlu0 %1244  ;;  %v1125_v49 = vpop.permute.xlu1 %1124 }
 0x2ba   : > { %v1264_v19 = vsel %vm626_vm8, %v1263_v47, %v1245_v48  ;;  %v1137_v43 = vsel %vm624_vm7, %v1136_v46, %v1125_v49  ;;  %v1515_v46 = vld [vmem:[%s2845_s7 + $0x70] sm:$0xff]  ;;  %v1514_v47 = vld [vmem:[%s2845_s7 + $0x68] sm:$0xff]  ;;  %v1513_v48 = vld [vmem:[%s2845_s7 + $0x60] sm:$0xff] }
 0x2bb   : > { %v1270_v50 = vrot.slane %v1264_v19, 4  ;;  %v1138_v51 = vsel %vm626_vm8, %v1137_v43, %v1129_v42  ;;  %1597 = vmatpush.msra.mxu2 %v1515_v46  ;;  %v1512_v49 = vld [vmem:[%s2845_s7 + $0x58] sm:$0xff]  ;;  %v1511_v19 = vld [vmem:[%s2845_s7 + $0x50] sm:$0xff]  ;;  %v1510_v43 = vld [vmem:[%s2845_s7 + $0x48] sm:$0xff] }
 0x2bc   : > { %1140 = vst [vmem:[#allocation5 + $0x8] sm:$0xf] %v1138_v51  ;;  %v1532_v51 = vld [vmem:[%s2845_s7 + $0xf8] sm:$0xff]  ;;  %v1569_v46 = vld [vmem:[%s2845_s7 + $0x220] sm:$0xff] }
 0x2bd   : > { %1276 = vst [vmem:[#allocation5 + $0x18] sm:$0xf0] %v1270_v50  ;;  %1598 = vmatpush.msra.mxu2 %v1514_v47  ;;  %v1509_v50 = vld [vmem:[%s2845_s7 + $0x40] sm:$0xff]  ;;  %1616 = vmatpush.msrb.mxu3 %v1532_v51  ;;  %v1536_v51 = vld [vmem:[%s2845_s7 + $0x118] sm:$0xff] }
 0x2bf   : > { %1599 = vmatpush.msra.mxu2 %v1513_v48  ;;  %1617 = vmatpush.msrb.mxu3 %v1531_v16  ;;  %v1537_v48 = vld [vmem:[%s2845_s7 + $0x120] sm:$0xff] }
 0x2c1   : > { %v1170_v55 = vpop.permute.xlu0 %1169  ;;  %v1255_v57 = vpop.permute.xlu1 %1254  ;;  %1600 = vmatpush.msra.mxu2 %v1512_v49 }
 0x2c2   : > { %v1178_v58 = vsel %vm626_vm8, %v1177_v56, %v1170_v55  ;;  %v1530_v55 = vld [vmem:[%s2845_s7 + $0xe8] sm:$0xff] }
 0x2c3   : > { %v1182_v59 = vrot.slane %v1178_v58, 4  ;;  %1601 = vmatpush.msra.mxu2 %v1511_v19  ;;  %v1506_v56 = vld [vmem:[%s2845_s7 + $0x28] sm:$0xff]  ;;  %1618 = vmatpush.msrb.mxu3 %v1530_v55  ;;  %v1505_v58 = vld [vmem:[%s2845_s7 + $0x20] sm:$0xff]  ;;  %v1567_v55 = vld [vmem:[%s2845_s7 + $0x210] sm:$0xff] }
 0x2c4   : > { %v1282_v60 = vld [vmem:[#allocation5 + $0x18] sm:$0xff]  ;;  %v1553_v19 = vld [vmem:[%s2845_s7 + $0x1a0] sm:$0xff] }
 0x2c5   : > { %1188 = vst [vmem:[#allocation5 + $0x8] sm:$0xf0] %v1182_v59  ;;  %1350 = vmatmul.f32.gmra.mxu3 %v1282_v60  ;;  %1602 = vmatpush.msra.mxu2 %v1510_v43  ;;  %v1528_v59 = vld [vmem:[%s2845_s7 + $0xd8] sm:$0xff] }
 0x2c6   : > { %v1504_v60 = vld [vmem:[%s2845_s7 + $0x18] sm:$0xff] }
 0x2c7   : > { %1603 = vmatpush.msra.mxu2 %v1509_v50  ;;  %v1568_v43 = vld [vmem:[%s2845_s7 + $0x218] sm:$0xff] }
 0x2c9   : > { %v1251_v7 = vpop.permute.xlu0 %1250  ;;  %v1214_v63 = vpop.permute.xlu1 %1213  ;;  %1604 = vmatpush.msra.mxu2 %v1508_v52 }
 0x2ca   : > { %v1226_v1 = vsel %vm624_vm7, %v1225_v62, %v1214_v63  ;;  %v1265_v6 = vsel %vm364_vm0, %v1247_v3, %v1251_v7  ;;  %v1503_v62 = vld [vmem:[%s2845_s7 + $0x10] sm:$0xff]  ;;  %v1526_v7 = vld [vmem:[%s2845_s7 + $0xc8] sm:$0xff]  ;;  %v1548_v3 = vld [vmem:[%s2845_s7 + $0x178] sm:$0xff] }
 0x2cb   : > { %v1227_v2 = vsel %vm626_vm8, %v1226_v1, %v1218_v0  ;;  %v1266_v8 = vsel %vm624_vm7, %v1265_v6, %v1255_v57  ;;  %v1529_v57 = vld [vmem:[%s2845_s7 + $0xe0] sm:$0xff]  ;;  %1605 = vmatpush.msra.mxu2 %v1507_v53  ;;  %v1502_v63 = vld [vmem:[%s2845_s7 + $0x8] sm:$0xff]  ;;  %1636 = vmatpush.msrb.mxu1 %v1548_v3  ;;  %v1523_v6 = vld [vmem:[%s2845_s7 + $0xb0] sm:$0xff] }
 0x2cc   : > { %1229 = vst [vmem:[#allocation5 + $0x20] sm:$0xf] %v1227_v2  ;;  %v1280_v4 = vld [vmem:[#allocation5 + $0x8] sm:$0xff]  ;;  %1619 = vmatpush.msrb.mxu3 %v1529_v57  ;;  %v1525_v0 = vld [vmem:[%s2845_s7 + $0xc0] sm:$0xff] }
 0x2cd   : > { %1370 = vmatmul.f32.vlgmr.msra.gmra.mxu1 %v1280_v4  ;;  %1811 = vmatmul.msk.f32.vlgmr.msra.gmra.mxu3 %vm364_vm0, %v1281_v5  ;;  %v1501_v1 = vld [vmem:[%s2845_s7] sm:$0xff]  ;;  %v1524_v2 = vld [vmem:[%s2845_s7 + $0xb8] sm:$0xff]  ;;  %v1547_v5 = vld [vmem:[%s2845_s7 + $0x170] sm:$0xff] }
 0x2ce   : > { %1606 = vmatpush.msra.mxu2 %v1506_v56  ;;  %1620 = vmatpush.msrb.mxu3 %v1528_v59  ;;  %v1564_v4 = vld [vmem:[%s2845_s7 + $0x1f8] sm:$0xff]  ;;  %v1533_v3 = vld [vmem:[%s2845_s7 + $0x100] sm:$0xff] }
 0x2cf   : > { %1637 = vmatpush.msrb.mxu1 %v1547_v5  ;;  %v1552_v53 = vld [vmem:[%s2845_s7 + $0x198] sm:$0xff] }
 0x2d0   : > { %1607 = vmatpush.msra.mxu2 %v1505_v58  ;;  %1621 = vmatpush.msrb.mxu3 %v1527_v61  ;;  %v1535_v58 = vld [vmem:[%s2845_s7 + $0x110] sm:$0xff] }
 0x2d1   : > { %v1259_v9 = vpop.permute.xlu0 %1258  ;;  %v1551_v61 = vld [vmem:[%s2845_s7 + $0x190] sm:$0xff] }
 0x2d2   : > { %v1267_v10 = vsel %vm626_vm8, %v1266_v8, %v1259_v9  ;;  %1608 = vmatpush.msra.mxu2 %v1504_v60  ;;  %1622 = vmatpush.msrb.mxu3 %v1526_v7  ;;  %v1563_v9 = vld [vmem:[%s2845_s7 + $0x1f0] sm:$0xff]  ;;  %v1546_v8 = vld [vmem:[%s2845_s7 + $0x168] sm:$0xff] }
 0x2d3   : > { %v1271_v11 = vrot.slane %v1267_v10, 4  ;;  %v1522_v10 = vld [vmem:[%s2845_s7 + $0xa8] sm:$0xff]  ;;  %1638 = vmatpush.msrb.mxu1 %v1546_v8 }
 0x2d4   : > { %1609 = vmatpush.msra.mxu2 %v1503_v62  ;;  %1623 = vmatpush.msrb.mxu3 %v1525_v0  ;;  %v1550_v0 = vld [vmem:[%s2845_s7 + $0x188] sm:$0xff] }
 0x2d5   : > { %1277 = vst [vmem:[#allocation5 + $0x20] sm:$0xf0] %v1271_v11  ;;  %1812 = vmatmul.msk.f32.gmra.mxu3 %vm364_vm0, %v1284_v12  ;;  %v1562_v11 = vld [vmem:[%s2845_s7 + $0x1e8] sm:$0xff]  ;;  %v1545_v12 = vld [vmem:[%s2845_s7 + $0x160] sm:$0xff] }
 0x2d6   : > { %1610 = vmatpush.msra.mxu2 %v1502_v63  ;;  %1624 = vmatpush.msrb.mxu3 %v1524_v2  ;;  %v1534_v63 = vld [vmem:[%s2845_s7 + $0x108] sm:$0xff] }
 0x2d7   : > { %1639 = vmatpush.msrb.mxu1 %v1545_v12 }
 0x2d8   : > { %1611 = vmatpush.msra.mxu2 %v1501_v1  ;;  %1625 = vmatpush.msrb.mxu3 %v1523_v6  ;;  %v1565_v1 = vld [vmem:[%s2845_s7 + $0x200] sm:$0xff] }
 0x2d9   : > { %v1549_v6 = vld [vmem:[%s2845_s7 + $0x180] sm:$0xff] }
 0x2da   : > { %1656 = vmatpush.msrb.mxu2 %v1564_v4  ;;  %1626 = vmatpush.msrb.mxu3 %v1522_v10 }
 0x2dc   : > { %v1283_v13 = vld [vmem:[#allocation5 + $0x20] sm:$0xff]  ;;  %1657 = vmatpush.msrb.mxu2 %v1563_v9 }
 0x2dd   : > { %1373 = vmatmul.f32.gmra.mxu1 %v1283_v13  ;;  %v1521_v13 = vld [vmem:[%s2845_s7 + $0xa0] sm:$0xff] }
 0x2de   : > { %1658 = vmatpush.msrb.mxu2 %v1562_v11  ;;  %1627 = vmatpush.msrb.mxu3 %v1521_v13 }
 0x330   : > { %v1348_v33 = vpop.f32.mrf.mxu3 }
 0x331   : > { %v1349_v18 = vadd.f32 %v1872_v15, %v1348_v33  ;;  %v1561_v33 = vld [vmem:[%s2845_s7 + $0x1e0] sm:$0xff] }
 0x332   : > { %1659 = vmatpush.msrb.mxu2 %v1561_v33 }
 0x348   : > { %v1351_v14 = vpop.f32.mrf.mxu3 }
 0x349   : > { %v1352_v22 = vadd.f32 %v1872_v15, %v1351_v14  ;;  %v1544_v14 = vld [vmem:[%s2845_s7 + $0x158] sm:$0xff] }
 0x34a   : > { %v1371_v17 = vpop.f32.mrf.mxu1  ;;  %v1520_v15 = vld [vmem:[%s2845_s7 + $0x98] sm:$0xff]  ;;  %1640 = vmatpush.msrb.mxu1 %v1544_v14 }
 0x34b   : > { %v1372_v20 = vadd.f32 %v1371_v17, %v1349_v18  ;;  %v1560_v17 = vld [vmem:[%s2845_s7 + $0x1d8] sm:$0xff]  ;;  %v1543_v18 = vld [vmem:[%s2845_s7 + $0x150] sm:$0xff]  ;;  %1628 = vmatpush.msrb.mxu3 %v1520_v15 }
 0x34c   : > { %1660 = vmatpush.msrb.mxu2 %v1560_v17  ;;  %1641 = vmatpush.msrb.mxu1 %v1543_v18 }
 0x350   : > { %v1394_v54 = vpop.f32.mrf.mxu3 }
 0x351   : > { %v1395_v21 = vadd.f32 %v1394_v54, %v1372_v20  ;;  %v1519_v20 = vld [vmem:[%s2845_s7 + $0x90] sm:$0xff] }
 0x352   : > { %v1559_v54 = vld [vmem:[%s2845_s7 + $0x1d0] sm:$0xff]  ;;  %1629 = vmatpush.msrb.mxu3 %v1519_v20 }
 0x353   : > { %v1400_v27 = vmax.f32 %v1395_v21, 0.0  ;;  %v1518_v21 = vld [vmem:[%s2845_s7 + $0x88] sm:$0xff]  ;;  %1661 = vmatpush.msrb.mxu2 %v1559_v54 }
 0x354   : > { %1630 = vmatpush.msrb.mxu3 %v1518_v21 }
 0x355   : > { %1402 = vst [vmem:[#allocation6] sm:$0xff] %v1400_v27  ;;  %v1542_v27 = vld [vmem:[%s2845_s7 + $0x148] sm:$0xff] }
 0x356   : > { %1642 = vmatpush.msrb.mxu1 %v1542_v27 }
 0x358   : > { %v1397_v25 = vpop.f32.mrf.mxu3 }
 0x35a   : > { %v1374_v23 = vpop.f32.mrf.mxu1 }
 0x35b   : > { %v1375_v24 = vadd.f32 %v1374_v23, %v1352_v22  ;;  %v1558_v22 = vld [vmem:[%s2845_s7 + $0x1c8] sm:$0xff]  ;;  %v1541_v23 = vld [vmem:[%s2845_s7 + $0x140] sm:$0xff] }
 0x35c   : > { %v2536_v26 = vld [vmem:[#allocation6 + $0x4] sm:$0xf]  ;;  %v2558_v39 = vld [vmem:[#allocation6] sm:$0xf]  ;;  %1662 = vmatpush.msrb.mxu2 %v1558_v22  ;;  %1643 = vmatpush.msrb.mxu1 %v1541_v23 }
 0x35d   : > { %v2538_v28 = vld [vmem:[#allocation6 + $0x4] sm:$0xf]  ;;  %v1398_v29 = vadd.f32 %v1397_v25, %v1375_v24  ;;  %1415 = vrot.lane.b32.xlu1 %v2536_v26, %s1938_s24  ;;  %v1408_v40 = vrot.slane %v2558_v39, 1  ;;  %v1420_v41 = vrot.slane %v2536_v26, 2  ;;  %v1412_v57 = vrot.slane %v2558_v39, 2 }
 0x35e   : > { %v1454_v30 = vrot.slane %v2538_v28, 1  ;;  %v1517_v24 = vld [vmem:[%s2845_s7 + $0x80] sm:$0xff]  ;;  %v1458_v47 = vrot.slane %v2538_v28, 2  ;;  %v1418_v9 = vrot.slane %v2536_v26, 1 }
 0x35f   : > { %v1401_v31 = vmax.f32 %v1398_v29, 0.0  ;;  %v1557_v25 = vld [vmem:[%s2845_s7 + $0x1c0] sm:$0xff]  ;;  %v1572_v29 = vld [vmem:[%s2845_s7 + $0x238] sm:$0xff]  ;;  %1631 = vmatpush.msrb.mxu3 %v1517_v24 }
 0x360   : > { %1455 = vrot.lane.b32.xlu2 %v1454_v30, %s1938_s24  ;;  %v1540_v30 = vld [vmem:[%s2845_s7 + $0x138] sm:$0xff]  ;;  %1663 = vmatpush.msrb.mxu2 %v1557_v25  ;;  %v1873_v23 = vld [vmem:[%s2846_s8] ss:$0 sm:$0xff] }
 0x361   : > { %1403 = vst [vmem:[#allocation6 + $0x8] sm:$0xff] %v1401_v31  ;;  %1684 = vmatpush.msra.mxu3 %v1572_v29  ;;  %1644 = vmatpush.msrb.mxu1 %v1540_v30 }
 0x368   : > { %v2544_v32 = vld [vmem:[#allocation6 + $0x8] sm:$0xf]  ;;  %v2546_v34 = vld [vmem:[#allocation6 + $0xc] sm:$0xf] }
 0x369   : > { %v2548_v35 = vld [vmem:[#allocation6 + $0x8] sm:$0xf]  ;;  %1461 = vrot.lane.b32.xlu0 %v2544_v32, %s1938_s24  ;;  %v1471_v36 = vrot.slane %v2546_v34, 1  ;;  %1497 = vst.msk [vmem:[#allocation7 + $0x10] sm:$0xc] %vm1496_vm9, %v2546_v34  ;;  %v1466_v44 = vrot.slane %v2544_v32, 2 }
 0x36a   : > { %v1425_v37 = vrot.slane %v2548_v35, 1  ;;  %v1429_v38 = vrot.slane %v2548_v35, 2  ;;  %v1464_v26 = vrot.slane %v2544_v32, 1 }
 0x36b   : > { %1472 = vrot.lane.b32.xlu1 %v1471_v36, %s1938_s24  ;;  %v1556_v36 = vld [vmem:[%s2845_s7 + $0x1b8] sm:$0xff] }
 0x36c   : > { %1449 = vst.msk [vmem:[#allocation7 + $0x10] sm:$0x3] %vm1448_vm10, %v1429_v38  ;;  %1426 = vrot.lane.b32.xlu2 %v1425_v37, %s1938_s24  ;;  %v1571_v37 = vld [vmem:[%s2845_s7 + $0x230] sm:$0xff]  ;;  %1664 = vmatpush.msrb.mxu2 %v1556_v36 }
 0x36d   : > { %v1539_v38 = vld [vmem:[%s2845_s7 + $0x130] sm:$0xff]  ;;  %1685 = vmatpush.msra.mxu3 %v1571_v37 }
 0x36e   : > { %1645 = vmatpush.msrb.mxu1 %v1539_v38 }
 0x371   : > { %1409 = vrot.lane.b32.xlu0 %v1408_v40, %s1938_s24 }
 0x373   : > { %v1500_v42 = vld [vmem:[#allocation7 + $0x10] sm:$0xf]  ;;  %1421 = vrot.lane.b32.xlu1 %v1420_v41, %s1938_s24  ;;  %v1555_v41 = vld [vmem:[%s2845_s7 + $0x1b0] sm:$0xff] }
 0x374   : > { %1584 = vst [vmem:[#allocation1 + $0x20] ss:$2 sm:$0xff] %v1500_v42  ;;  %v1570_v42 = vld [vmem:[%s2845_s7 + $0x228] sm:$0xff]  ;;  %1665 = vmatpush.msrb.mxu2 %v1555_v41 }
 0x375   : > { %1686 = vmatpush.msra.mxu3 %v1570_v42 }
 0x376   : > { %1666 = vmatpush.msrb.mxu2 %v1554_v45 }
 0x377   : > { %1687 = vmatpush.msra.mxu3 %v1569_v46 }
 0x378   : > { %1667 = vmatpush.msrb.mxu2 %v1553_v19 }
 0x379   : > { %1467 = vrot.lane.b32.xlu0 %v1466_v44, %s1938_s24  ;;  %v1538_v44 = vld [vmem:[%s2845_s7 + $0x128] sm:$0xff]  ;;  %1688 = vmatpush.msra.mxu3 %v1568_v43  ;;  %s325_s24 = scalar_lea.vmem [#allocation8], %s1777_s28 }
 0x37a   : > { %1646 = vmatpush.msrb.mxu1 %v1538_v44  ;;  %1668 = vmatpush.msrb.mxu2 %v1552_v53  ;;  %s1711_s26 = sshll.u32 %s325_s24, 4  ;;  %s1712_s26 = int_to_ptr.vmem [resolvable:$true] %s1711_s26 }
 0x37b   : > { %1689 = vmatpush.msra.mxu3 %v1567_v55 }
 0x37c   : > { %1647 = vmatpush.msrb.mxu1 %v1537_v48  ;;  %1669 = vmatpush.msrb.mxu2 %v1551_v61 }
 0x37e   : > { %1648 = vmatpush.msrb.mxu1 %v1536_v51  ;;  %1670 = vmatpush.msrb.mxu2 %v1550_v0 }
 0x380   : > { %1649 = vmatpush.msrb.mxu1 %v1535_v58  ;;  %1671 = vmatpush.msrb.mxu2 %v1549_v6 }
 0x382   : > { %1650 = vmatpush.msrb.mxu1 %v1534_v63 }
 0x384   : > { %1651 = vmatpush.msrb.mxu1 %v1533_v3 }
 0x3ba   : > { %v1456_v40 = vpop.permute.xlu2 %1455 }
 0x3bb   : > { %v1476_v56 = vsel %vm624_vm7, %v2538_v28, %v1456_v40  ;;  %v1566_v28 = vld [vmem:[%s2845_s7 + $0x208] sm:$0xff] }
 0x3bc   : > { %1690 = vmatpush.msra.mxu3 %v1566_v28 }
 0x3be   : > { %1691 = vmatpush.msra.mxu3 %v1565_v1 }
 0x3c6   : > { %v1427_v59 = vpop.permute.xlu2 %1426 }
 0x3c7   : > { %v1434_v2 = vsel %vm624_vm7, %v2548_v35, %v1427_v59 }
 0x3c8   : > { %v1440_v35 = vrot.slane %v1434_v2, 4 }
 0x3cf   : > { %v1416_v31 = vpop.permute.xlu1 %1415 }
 0x3d0   : > { %v1432_v62 = vsel %vm624_vm7, %v1412_v57, %v1416_v31 }
 0x3d1   : > { %v1439_v4 = vrot.slane %v1432_v62, 4 }
 0x3db   : > { %v1462_v49 = vpop.permute.xlu0 %1461 }
 0x3dc   : > { %v1477_v50 = vsel %vm624_vm7, %v1458_v47, %v1462_v49 }
 0x3dd   : > { %v1484_v52 = vrot.slane %v1477_v50, 4  ;;  %v1473_v16 = vpop.permute.xlu1 %1472 }
 0x3de   : > { %v1479_v33 = vsel %vm624_vm7, %v2546_v34, %v1473_v16  ;;  %v1589_v34 = vld.sshfl [vmem:[#allocation1 + $0x20] sm:$0xff pattern:$0x75316420] }
 0x3df   : > { %v1486_v60 = vsel %vm1441_vm11, %v1476_v56, %v1484_v52 }
 0x3e0   : > { %v1488_v7 = vrot.slane %v1486_v60, 6 }
 0x3e2   : > { %1494 = vst [vmem:[#allocation7] sm:$0xcc] %v1488_v7 }
 0x3e3   : > { %v1410_v5 = vpop.permute.xlu0 %1409 }
 0x3e4   : > { %v1431_v8 = vsel %vm624_vm7, %v2558_v39, %v1410_v5  ;;  %v1485_v39 = vrot.slane %v1479_v33, 4 }
 0x3e5   : > { %v1442_v10 = vsel %vm1441_vm11, %v1431_v8, %v1439_v4  ;;  %v1422_v11 = vpop.permute.xlu1 %1421 }
 0x3e6   : > { %1446 = vst [vmem:[#allocation7] sm:$0x33] %v1442_v10  ;;  %v1433_v12 = vsel %vm624_vm7, %v1418_v9, %v1422_v11 }
 0x3e7   : > { %v1443_v13 = vsel %vm1441_vm11, %v1433_v12, %v1440_v35 }
 0x3e8   : > { %1447 = vst [vmem:[#allocation7 + $0x8] sm:$0x33] %v1443_v13 }
 0x3eb   : > { %v1468_v14 = vpop.permute.xlu0 %1467 }
 0x3ec   : > { %v1478_v15 = vsel %vm624_vm7, %v1464_v26, %v1468_v14 }
 0x3ed   : > { %v1487_v17 = vsel %vm1441_vm11, %v1478_v15, %v1485_v39  ;;  %v1498_v18 = vld [vmem:[#allocation7] sm:$0xff] }
 0x3ee   : > { %v1489_v20 = vrot.slane %v1487_v17, 6  ;;  %1580 = vst [vmem:[#allocation1] ss:$2 sm:$0xff] %v1498_v18 }
 0x3f0   : > { %1495 = vst [vmem:[#allocation7 + $0x8] sm:$0xcc] %v1489_v20 }
 0x3f5   : > { %v1585_v54 = vld.sshfl [vmem:[#allocation1] sm:$0xff pattern:$0x75316420]  ;;  %v1586_v21 = vld.sshfl [vmem:[#allocation1 + $0x8] sm:$0xff pattern:$0x75316420] }
 0x3f6   : > { %1612 = vmatmul.f32.vlgmr.msra.gmra.mxu2 %v1585_v54  ;;  %1632 = vmatmul.f32.vlgmr.msrb.gmra.mxu3 %v1586_v21 }
 0x3f7   : > { %v1499_v27 = vld [vmem:[#allocation7 + $0x8] sm:$0xff] }
 0x3f8   : > { %1582 = vst [vmem:[#allocation1 + $0x10] ss:$2 sm:$0xff] %v1499_v27 }
 0x3fe   : > { %1814 = vmatmul.msk.f32.vlgmr.msra.gmra.mxu3 %vm624_vm7, %v1589_v34 }
 0x3ff   : > { %v1587_v32 = vld.sshfl [vmem:[#allocation1 + $0x10] sm:$0xff pattern:$0x75316420]  ;;  %v1588_v22 = vld.sshfl [vmem:[#allocation1 + $0x18] sm:$0xff pattern:$0x75316420] }
 0x400   : > { %1652 = vmatmul.f32.vlgmr.msrb.gmra.mxu1 %v1587_v32  ;;  %1672 = vmatmul.f32.vlgmr.msrb.gmra.mxu2 %v1588_v22 }
 0x479   : > { %v1613_v24 = vpop.f32.mrf.mxu2  ;;  %v1633_v29 = vpop.f32.mrf.mxu3 }
 0x47a   : > { %v1614_v25 = vadd.f32 %v1873_v23, %v1613_v24 }
 0x47c   : > { %v1634_v30 = vadd.f32 %v1633_v29, %v1614_v25 }
 0x47d   : > { %v1653_v31 = vpop.f32.mrf.mxu1 }
 0x47e   : > { %v1654_v36 = vadd.f32 %v1653_v31, %v1634_v30 }
 0x481   : > { %v1693_v40 = vpop.f32.mrf.mxu3 }
 0x483   : > { %v1673_v37 = vpop.f32.mrf.mxu2 }
 0x484   : > { %v1674_v38 = vadd.f32 %v1673_v37, %v1654_v36 }
 0x486   : > { %v1694_v41 = vadd.f32 %v1693_v40, %v1674_v38 }
 0x488   : > { %v1696_v42 = vmax.f32 %v1694_v41, 0.0 }
 0x48a   : > { %1697 = vst [vmem:[%s325_s24] sm:$0xf] %v1696_v42 }
 0x48b   : > { %1901 = shalt.err (!%p1898_p3)
}
 0x48c   : > { %1828 = dma.vmem_to_hbm [thread:$0]  (%p2029_p5), %s1712_s26, 64, %s1714_s17, %s1699_s21  }
 0x48d PF: > { %p1834_p4 = scmp.ge.s32.totalorder %s1936_s12, 2  ;;  %s1725_s27 = sand.u32 1, %s1924_s30  }
 0x48e   : > { %s1726_s25 = scalar_lea.sflag [#allocation9], %s1725_s27 }
 0x48f   : > { %p1831_p7 = pnand %p1834_p4, %p2033_p6 }
 0x491   : > { %p1832_p8 = pneg %p1831_p7 }
 0x493   : > { %1919 = dma.done.wait (%p1832_p8), %s1726_s25, 64  }
 0x494   : > { %1921 = vsyncadd (%p1832_p8), %s1726_s25, 4294967232  ;;  %p19_p9 = scmp.ge.s32.totalorder %s2016_s15, 4   ;;  %s2850_s30 = smov %s1928_s10 }
 0x495   : > { %s2851_s10 = smov %s1932_s11  ;;  %s2852_s11 = smov %s2027_s18 }
 0x496   : > { %s2853_s12 = smov %s2016_s15  ;;  %21 = sbr.rel (!%p19_p9) target bundleno = 3 (0x3), region = 131 }
 0x49b   :  { %1732 = vsyncpa [#allocation9], 1 }
 0x49c   :  { %1734 = vsyncpa [#allocation9 + $0x1], 1 }

</bundles_post_ra>
